<compile_context>
chip_gen: v5e
topology: v5e:2x2
jax: 0.10.0
libtpu: 0.0.40
codegen_flags: <defaults>
</compile_context>

<pallas_src>
import functools

import jax
import jax.numpy as jnp
from jax.experimental import pallas as pl
from jax.experimental.pallas import tpu as pltpu


def _round_up(x, m):
    return ((x + m - 1) // m) * m


def _pick_hidden_tile(d, target):
    """Largest multiple-of-128 divisor of d that is <= target (else d itself)."""
    if d <= target:
        return d
    t = (target // 128) * 128
    while t >= 128:
        if d % t == 0:
            return t
        t -= 128
    return d  # no clean divisor: keep the whole hidden dim in one slab


def _dim_map_net_kernel(state_ref, label_ref, w1_ref, b1_ref, w2_ref, b2_ref,
                        out_ref, acc_ref, *, batch_size):
    i = pl.program_id(0)                      # batch tile
    n = pl.program_id(1)                      # hidden slab (reduction-like axis)
    n_last = pl.num_programs(1) - 1
    tm = acc_ref.shape[0]

    @pl.when(n == 0)
    def _():
        acc_ref[...] = jnp.zeros_like(acc_ref)

    # ---- hidden slab: [TM, D] @ [D, TN] on the MXU (f32 accumulation) ----
    x = state_ref[...]                        # [TM, D]  (bf16 by default)
    h = jnp.dot(x, w1_ref[...], preferred_element_type=jnp.float32)
    h = jnp.maximum(h + b1_ref[...], 0.0)     # [TM, TN] f32 (ReLU)

    # ---- fold slab into the D->1 projection: VPU multiply + lane reduce ----
    acc_ref[...] += jnp.sum(h * w2_ref[...], axis=-1, keepdims=True)   # [TM, 1]

    # ---- finalize: sigmoid + per-row BCE term on the last hidden slab ----
    @pl.when(n == n_last)
    def _():
        z = acc_ref[...] + b2_ref[0, 0]                        # [TM, 1]
        # shared softplus pieces: softplus(+-z) = max(+-z, 0) + log(1+exp(-|z|))
        t = jnp.log(1.0 + jnp.exp(-jnp.abs(z)))
        sp_pos = jnp.maximum(z, 0.0) + t                       # = -log(1 - p)
        sp_neg = jnp.maximum(-z, 0.0) + t                      # = -log(p)
        p = jnp.exp(-sp_neg)                                   # sigmoid(z)
        log_p = jnp.maximum(-sp_neg, -100.0)                   # torch BCELoss clamp
        log_1mp = jnp.maximum(-sp_pos, -100.0)
        y = label_ref[...].astype(jnp.float32)                 # [TM, 1]
        bce = -(y * log_p + (1.0 - y) * log_1mp)
        # zero rows past the real batch so the wrapper can just sum
        row = jax.lax.broadcasted_iota(jnp.int32, (tm, 1), 0) + i * tm
        bce = jnp.where(row < batch_size, bce, 0.0)
        out_ref[:, 0:1] = p.astype(out_ref.dtype)
        out_ref[:, 1:2] = bce.astype(out_ref.dtype)


def dim_map_net(state, label, w1, b1, w2, b2, *, block_b=256, block_n=512,
                matmul_dtype=jnp.bfloat16):
    """Forward pass matching DimMapNet.forward -> (out [B, 1], scalar BCE loss).

    state: [B, D]   label: [B, 1]
    w1: [D, D] (= torch weight1.T)   b1: [1, D] or [D]
    w2: [D, 1] (= torch weight2.T)   b2: [1, 1] or [1]
    matmul_dtype: MXU feed dtype for state/w1 (default bf16; None/f32 = bit-faithful).
    """
    B, D = state.shape
    assert label.shape == (B, 1)
    assert w1.shape == (D, D) and w2.shape == (D, 1)

    tm = _round_up(min(block_b, B), 8)
    n_bt = pl.cdiv(B, tm)
    tn = _pick_hidden_tile(D, block_n)
    n_nt = D // tn

    if matmul_dtype is not None and state.dtype != matmul_dtype:
        state = state.astype(matmul_dtype)
    if matmul_dtype is not None and w1.dtype != matmul_dtype:
        w1 = w1.astype(matmul_dtype)

    b1_row = jnp.reshape(b1, (1, D)).astype(jnp.float32)
    w2_row = jnp.reshape(w2, (1, D)).astype(jnp.float32)
    b2_s = jnp.reshape(b2, (1, 1)).astype(jnp.float32)
    label_f = label.astype(jnp.float32)

    kernel = functools.partial(_dim_map_net_kernel, batch_size=B)

    in_itemsize = jnp.dtype(state.dtype).itemsize
    w_itemsize = jnp.dtype(w1.dtype).itemsize
    # VMEM footprint: double-buffered streamed blocks + scratch + h temporaries.
    est_vmem = (2 * tm * D * in_itemsize          # state tile (x2 buffers)
                + 2 * D * tn * w_itemsize         # w1 slab   (x2 buffers)
                + 4 * tn * 4                      # b1, w2 slabs
                + 2 * tm * 4                      # label tile
                + 2 * tm * 2 * 4                  # merged output block
                + tm * 128 * 4                    # acc scratch (padded tile)
                + 2 * tm * tn * 4)                # h / product temporaries
    vmem_limit = int(min(max(2 * est_vmem, 32 << 20), 56 << 20))  # v7x-safe cap

    bytes_accessed = int(B * D * in_itemsize            # state, read once
                         + n_bt * D * D * w_itemsize    # w1 re-streamed per batch tile
                         + n_bt * 2 * D * 4             # b1, w2
                         + B * 4 + B * 2 * 4)           # label + merged output

    out_arr = pl.pallas_call(
        kernel,
        grid=(n_bt, n_nt),
        in_specs=[
            pl.BlockSpec((tm, D), lambda i, n: (i, 0)),     # state tile (resident over n)
            pl.BlockSpec((tm, 1), lambda i, n: (i, 0)),     # label column
            pl.BlockSpec((D, tn), lambda i, n: (0, n)),     # w1 hidden slab
            pl.BlockSpec((1, tn), lambda i, n: (0, n)),     # b1 slab
            pl.BlockSpec((1, tn), lambda i, n: (0, n)),     # w2 slab (row form)
            pl.BlockSpec(memory_space=pltpu.MemorySpace.SMEM),   # b2 scalar
        ],
        out_specs=pl.BlockSpec((tm, 2), lambda i, n: (i, 0)),    # [p | bce] merged
        out_shape=jax.ShapeDtypeStruct((B, 2), jnp.float32),
        scratch_shapes=[pltpu.VMEM((tm, 1), jnp.float32)],       # z accumulator
        compiler_params=pltpu.CompilerParams(
            dimension_semantics=("parallel", "arbitrary"),
            vmem_limit_bytes=vmem_limit,
        ),
        cost_estimate=pl.CostEstimate(
            flops=2 * B * D * D + 8 * B * D,
            transcendentals=3 * B,          # exp(-|z|), log(1+.), exp(-softplus)
            bytes_accessed=bytes_accessed,
        ),
    )(state, label_f, w1, b1_row, w2_row, b2_s)

    out = out_arr[:, 0:1]                       # [B, 1] sigmoid probabilities
    loss = jnp.sum(out_arr[:, 1]) / B           # BCELoss mean (padded rows zeroed)
    return out, loss


def init_params(key, input_dim):
    """PyTorch nn.Linear-style init: U(-k, k), k = 1/sqrt(fan_in)."""
    k1, k2, k3, k4 = jax.random.split(key, 4)
    k = 1.0 / jnp.sqrt(jnp.float32(input_dim))
    w1 = jax.random.uniform(k1, (input_dim, input_dim), jnp.float32, -k, k)
    b1 = jax.random.uniform(k2, (1, input_dim), jnp.float32, -k, k)
    w2 = jax.random.uniform(k3, (input_dim, 1), jnp.float32, -k, k)
    b2 = jax.random.uniform(k4, (1, 1), jnp.float32, -k, k)
    return w1, b1, w2, b2


if __name__ == "__main__":
    # Small shapes (real module uses input_dim=2304).  block_b=128 / block_n=256
    # exercise both the batch grid (2 tiles) and the hidden-slab accumulation
    # loop (2 slabs).
    B, D = 256, 512

    key = jax.random.PRNGKey(0)
    k_state, k_label, k_params = jax.random.split(key, 3)
    state = jax.random.normal(k_state, (B, D), jnp.float32)
    label = jax.random.bernoulli(k_label, 0.5, (B, 1)).astype(jnp.float32)
    w1, b1, w2, b2 = init_params(k_params, D)

    # Default path: bf16-fed MXU, f32 accumulation.
    out, loss = dim_map_net(state, label, w1, b1, w2, b2, block_b=128, block_n=256)
    jax.block_until_ready((out, loss))

    # Plain-JAX reference (PyTorch semantics), full-precision matmuls.
    h_ref = jnp.maximum(
        jnp.dot(state, w1, precision=jax.lax.Precision.HIGHEST) + b1, 0.0)
    z_ref = jnp.dot(h_ref, w2, precision=jax.lax.Precision.HIGHEST) + b2
    p_ref = jax.nn.sigmoid(z_ref)
    log_p = jnp.maximum(jnp.log(p_ref), -100.0)
    log_1mp = jnp.maximum(jnp.log(1.0 - p_ref), -100.0)
    loss_ref = jnp.mean(-(label * log_p + (1.0 - label) * log_1mp))

    assert out.shape == (B, 1) and loss.shape == ()
    assert jnp.allclose(out, p_ref, atol=2e-2), float(jnp.max(jnp.abs(out - p_ref)))
    assert jnp.allclose(loss, loss_ref, atol=5e-2), float(jnp.abs(loss - loss_ref))

    # Opt-in f32 MXU feed (bit-faithful path), tighter tolerance.
    out32, loss32 = dim_map_net(state, label, w1, b1, w2, b2,
                                block_b=128, block_n=256,
                                matmul_dtype=jnp.float32)
    jax.block_until_ready((out32, loss32))
    assert jnp.allclose(out32, p_ref, atol=5e-3), float(jnp.max(jnp.abs(out32 - p_ref)))
    assert jnp.allclose(loss32, loss_ref, atol=1e-2), float(jnp.abs(loss32 - loss_ref))

    print("KERNEL_OK")
</pallas_src>

<mosaic_0001>
module attributes {stable_mosaic.version = 11 : i64} {
  func.func @_dim_map_net_kernel(%arg0: i32, %arg1: i32, %arg2: memref<128x512xbf16, #tpu.memory_space<vmem>>, %arg3: memref<128x1xf32, #tpu.memory_space<vmem>>, %arg4: memref<512x256xbf16, #tpu.memory_space<vmem>>, %arg5: memref<1x256xf32, #tpu.memory_space<vmem>>, %arg6: memref<1x256xf32, #tpu.memory_space<vmem>>, %arg7: memref<1x1xf32, #tpu.memory_space<smem>>, %arg8: memref<128x2xf32, #tpu.memory_space<vmem>>, %arg9: memref<128x1xf32, #tpu.memory_space<vmem>>) attributes {dimension_semantics = [#tpu.dimension_semantics<parallel>, #tpu.dimension_semantics<arbitrary>], iteration_bounds = array<i64: 2, 2>, scalar_prefetch = 0 : i64, scratch_operands = 1 : i64, tpu.core_type = #tpu.core_type<tc>, window_params = [{transform_indices = @transform_0, window_bounds = array<i64: 128, 512>}, {transform_indices = @transform_1, window_bounds = array<i64: 128, 1>}, {transform_indices = @transform_2, window_bounds = array<i64: 512, 256>}, {transform_indices = @transform_3, window_bounds = array<i64: 1, 256>}, {transform_indices = @transform_4, window_bounds = array<i64: 1, 256>}, {transform_indices = @transform_5, window_bounds = array<i64: 1, 1>}, {transform_indices = @transform_6, window_bounds = array<i64: 128, 2>}]} {
    %c0_i32 = arith.constant 0 : i32
    %0 = arith.cmpi eq, %arg1, %c0_i32 : i32
    %1 = arith.extui %0 : i1 to i32
    %c0_i32_0 = arith.constant 0 : i32
    %2 = arith.cmpi ne, %1, %c0_i32_0 : i32
    scf.if %2 {
      %cst_15 = arith.constant 0.000000e+00 : f32
      %22 = vector.broadcast %cst_15 : f32 to vector<128x1xf32>
      %c0_16 = arith.constant 0 : index
      %c0_17 = arith.constant 0 : index
      %23 = vector.load %arg9[%c0_16, %c0_17] : memref<128x1xf32, #tpu.memory_space<vmem>>, vector<128x1xf32>
      tpu.vector_store %arg9[%c0_16, %c0_17], %22 {strides = array<i32>} : memref<128x1xf32, #tpu.memory_space<vmem>>, vector<128x1xf32>,
    } else {
    }
    %c0 = arith.constant 0 : index
    %c0_1 = arith.constant 0 : index
    %3 = vector.load %arg2[%c0, %c0_1] : memref<128x512xbf16, #tpu.memory_space<vmem>>, vector<128x512xbf16>
    %c0_2 = arith.constant 0 : index
    %c0_3 = arith.constant 0 : index
    %4 = vector.load %arg4[%c0_2, %c0_3] : memref<512x256xbf16, #tpu.memory_space<vmem>>, vector<512x256xbf16>
    %cst = arith.constant dense<0.000000e+00> : vector<128x256xf32>
    %5 = tpu.matmul %3, %4, %cst {dimension_numbers = #tpu.dot_dimension_numbers<[1], [0], [0], [1], [0, 0, 1, 1], [], []>} : vector<128x512xbf16>, vector<512x256xbf16>, vector<128x256xf32> -> vector<128x256xf32>
    %c0_4 = arith.constant 0 : index
    %c0_5 = arith.constant 0 : index
    %6 = vector.load %arg5[%c0_4, %c0_5] : memref<1x256xf32, #tpu.memory_space<vmem>>, vector<1x256xf32>
    %7 = vector.broadcast %6 : vector<1x256xf32> to vector<128x256xf32>
    %8 = arith.addf %5, %7 : vector<128x256xf32>
    %cst_6 = arith.constant 0.000000e+00 : f32
    %9 = vector.broadcast %cst_6 : f32 to vector<128x256xf32>
    %10 = arith.maximumf %8, %9 : vector<128x256xf32>
    %c0_7 = arith.constant 0 : index
    %c0_8 = arith.constant 0 : index
    %11 = vector.load %arg9[%c0_7, %c0_8] : memref<128x1xf32, #tpu.memory_space<vmem>>, vector<128x1xf32>
    %c0_9 = arith.constant 0 : index
    %c0_10 = arith.constant 0 : index
    %12 = vector.load %arg6[%c0_9, %c0_10] : memref<1x256xf32, #tpu.memory_space<vmem>>, vector<1x256xf32>
    %13 = vector.broadcast %12 : vector<1x256xf32> to vector<128x256xf32>
    %14 = arith.mulf %10, %13 : vector<128x256xf32>
    %cst_11 = arith.constant dense<0.000000e+00> : vector<128xf32>
    %15 = vector.multi_reduction <add>, %14, %cst_11 [1] : vector<128x256xf32> to vector<128xf32>
    %16 = vector.shape_cast %15 : vector<128xf32> to vector<128x1xf32>
    %17 = arith.addf %11, %16 : vector<128x1xf32>
    %c0_12 = arith.constant 0 : index
    %c0_13 = arith.constant 0 : index
    %18 = vector.load %arg9[%c0_12, %c0_13] : memref<128x1xf32, #tpu.memory_space<vmem>>, vector<128x1xf32>
    tpu.vector_store %arg9[%c0_12, %c0_13], %17 {strides = array<i32>} : memref<128x1xf32, #tpu.memory_space<vmem>>, vector<128x1xf32>,
    %c1_i32 = arith.constant 1 : i32
    %19 = arith.cmpi eq, %arg1, %c1_i32 : i32
    %20 = arith.extui %19 : i1 to i32
    %c0_i32_14 = arith.constant 0 : i32
    %21 = arith.cmpi ne, %20, %c0_i32_14 : i32
    scf.if %21 {
      %c0_15 = arith.constant 0 : index
      %c0_16 = arith.constant 0 : index
      %22 = vector.load %arg9[%c0_15, %c0_16] : memref<128x1xf32, #tpu.memory_space<vmem>>, vector<128x1xf32>
      %c0_17 = arith.constant 0 : index
      %c0_18 = arith.constant 0 : index
      %23 = memref.load %arg7[%c0_17, %c0_18] : memref<1x1xf32, #tpu.memory_space<smem>>
      %24 = vector.broadcast %23 : f32 to vector<128x1xf32>
      %25 = arith.addf %22, %24 : vector<128x1xf32>
      %26 = math.absf %25 : vector<128x1xf32>
      %cst_19 = arith.constant 0.000000e+00 : f32
      %27 = vector.broadcast %cst_19 : f32 to vector<128x1xf32>
      %28 = arith.subf %27, %26 : vector<128x1xf32>
      %29 = math.exp %28 : vector<128x1xf32>
      %cst_20 = arith.constant 1.000000e+00 : f32
      %30 = vector.broadcast %cst_20 : f32 to vector<128x1xf32>
      %31 = arith.addf %30, %29 : vector<128x1xf32>
      %32 = math.log %31 : vector<128x1xf32>
      %cst_21 = arith.constant 0.000000e+00 : f32
      %33 = vector.broadcast %cst_21 : f32 to vector<128x1xf32>
      %34 = arith.maximumf %25, %33 : vector<128x1xf32>
      %35 = arith.addf %34, %32 : vector<128x1xf32>
      %cst_22 = arith.constant 0.000000e+00 : f32
      %36 = vector.broadcast %cst_22 : f32 to vector<128x1xf32>
      %37 = arith.subf %36, %25 : vector<128x1xf32>
      %cst_23 = arith.constant 0.000000e+00 : f32
      %38 = vector.broadcast %cst_23 : f32 to vector<128x1xf32>
      %39 = arith.maximumf %37, %38 : vector<128x1xf32>
      %40 = arith.addf %39, %32 : vector<128x1xf32>
      %cst_24 = arith.constant 0.000000e+00 : f32
      %41 = vector.broadcast %cst_24 : f32 to vector<128x1xf32>
      %42 = arith.subf %41, %40 : vector<128x1xf32>
      %43 = math.exp %42 : vector<128x1xf32>
      %cst_25 = arith.constant 0.000000e+00 : f32
      %44 = vector.broadcast %cst_25 : f32 to vector<128x1xf32>
      %45 = arith.subf %44, %40 : vector<128x1xf32>
      %cst_26 = arith.constant -1.000000e+02 : f32
      %46 = vector.broadcast %cst_26 : f32 to vector<128x1xf32>
      %47 = arith.maximumf %45, %46 : vector<128x1xf32>
      %cst_27 = arith.constant 0.000000e+00 : f32
      %48 = vector.broadcast %cst_27 : f32 to vector<128x1xf32>
      %49 = arith.subf %48, %35 : vector<128x1xf32>
      %cst_28 = arith.constant -1.000000e+02 : f32
      %50 = vector.broadcast %cst_28 : f32 to vector<128x1xf32>
      %51 = arith.maximumf %49, %50 : vector<128x1xf32>
      %c0_29 = arith.constant 0 : index
      %c0_30 = arith.constant 0 : index
      %52 = vector.load %arg3[%c0_29, %c0_30] : memref<128x1xf32, #tpu.memory_space<vmem>>, vector<128x1xf32>
      %53 = arith.mulf %52, %47 : vector<128x1xf32>
      %cst_31 = arith.constant 1.000000e+00 : f32
      %54 = vector.broadcast %cst_31 : f32 to vector<128x1xf32>
      %55 = arith.subf %54, %52 : vector<128x1xf32>
      %56 = arith.mulf %55, %51 : vector<128x1xf32>
      %57 = arith.addf %53, %56 : vector<128x1xf32>
      %cst_32 = arith.constant 0.000000e+00 : f32
      %58 = vector.broadcast %cst_32 : f32 to vector<128x1xf32>
      %59 = arith.subf %58, %57 : vector<128x1xf32>
      %60 = tpu.iota {dimensions = array<i32: 0>} : vector<128x1xi32>
      %c128_i32 = arith.constant 128 : i32
      %61 = arith.muli %arg0, %c128_i32 : i32
      %62 = vector.broadcast %61 : i32 to vector<128x1xi32>
      %63 = arith.addi %60, %62 : vector<128x1xi32>
      %c256_i32 = arith.constant 256 : i32
      %64 = vector.broadcast %c256_i32 : i32 to vector<128x1xi32>
      %65 = arith.cmpi slt, %63, %64 : vector<128x1xi32>
      %cst_33 = arith.constant 0.000000e+00 : f32
      %66 = vector.broadcast %cst_33 : f32 to vector<128x1xf32>
      %67 = arith.select %65, %59, %66 : vector<128x1xi1>, vector<128x1xf32>
      %c0_34 = arith.constant 0 : index
      %c0_35 = arith.constant 0 : index
      %68 = vector.load %arg8[%c0_34, %c0_35] : memref<128x2xf32, #tpu.memory_space<vmem>>, vector<128x1xf32>
      tpu.vector_store %arg8[%c0_34, %c0_35], %43 {strides = array<i32>} : memref<128x2xf32, #tpu.memory_space<vmem>>, vector<128x1xf32>,
      %c0_36 = arith.constant 0 : index
      %c1 = arith.constant 1 : index
      %69 = vector.load %arg8[%c0_36, %c1] : memref<128x2xf32, #tpu.memory_space<vmem>>, vector<128x1xf32>
      tpu.vector_store %arg8[%c0_36, %c1], %67 {strides = array<i32>} : memref<128x2xf32, #tpu.memory_space<vmem>>, vector<128x1xf32>,
    } else {
    }
    return
  }
  func.func @transform_0(%arg0: i32, %arg1: i32) -> (i32, i32) {
    %c0_i32 = arith.constant 0 : i32
    %c0_i32_0 = arith.constant 0 : i32
    return %arg0, %c0_i32 : i32, i32
  }
  func.func @transform_1(%arg0: i32, %arg1: i32) -> (i32, i32) {
    %c0_i32 = arith.constant 0 : i32
    %c0_i32_0 = arith.constant 0 : i32
    return %arg0, %c0_i32 : i32, i32
  }
  func.func @transform_2(%arg0: i32, %arg1: i32) -> (i32, i32) {
    %c0_i32 = arith.constant 0 : i32
    %c0_i32_0 = arith.constant 0 : i32
    return %c0_i32, %arg1 : i32, i32
  }
  func.func @transform_3(%arg0: i32, %arg1: i32) -> (i32, i32) {
    %c0_i32 = arith.constant 0 : i32
    %c0_i32_0 = arith.constant 0 : i32
    return %c0_i32, %arg1 : i32, i32
  }
  func.func @transform_4(%arg0: i32, %arg1: i32) -> (i32, i32) {
    %c0_i32 = arith.constant 0 : i32
    %c0_i32_0 = arith.constant 0 : i32
    return %c0_i32, %arg1 : i32, i32
  }
  func.func @transform_5(%arg0: i32, %arg1: i32) -> (i32, i32) {
    %c0_i32 = arith.constant 0 : i32
    %c0_i32_0 = arith.constant 0 : i32
    %c0_i32_1 = arith.constant 0 : i32
    return %c0_i32, %c0_i32_0 : i32, i32
  }
  func.func @transform_6(%arg0: i32, %arg1: i32) -> (i32, i32) {
    %c0_i32 = arith.constant 0 : i32
    %c0_i32_0 = arith.constant 0 : i32
    return %arg0, %c0_i32 : i32, i32
  }
}

</mosaic_0001>

<bundles_post_ra>
// kernel: tpu_custom_call.1
= control target key start
LH: loop header
LB: loop body
LE: loop exit
PB: predicated region body
PF: predicated region fallthrough
CT: control target
= control target key end

     0   :  { %s4317_s0 = inlined_call_operand.hbm [shape: bf16[256,512], index: 0, kind: input, shape index: {}]   ;;  %s4318_s1 = inlined_call_operand.vmem [shape: f32[256,1], index: 1, kind: input, shape index: {}]   ;;  %s4319_s2 = inlined_call_operand.hbm [shape: bf16[512,512], index: 2, kind: input, shape index: {}]   ;;  %s4320_s3 = inlined_call_operand.vmem [shape: f32[1,512], index: 3, kind: input, shape index: {}]   ;;  %s4321_s4 = inlined_call_operand.vmem [shape: f32[1,512], index: 4, kind: input, shape index: {}]   ;;  %s4322_s5 = inlined_call_operand.<no memory space> [shape: f32[1,1], index: 5, kind: input, shape index: {}]   ;;  %s4323_s6 = inlined_call_operand.vmem [shape: f32[256,2], index: 6, kind: output, shape index: {}]  }
   0x1   :  { %4328 = sst [smem:[#allocation13_spill]] %s4317_s0 }
   0x2   :  { %4329 = sst [smem:[#allocation14_spill]] %s4319_s2 }
   0x3   :  { %4330 = sst [smem:[#allocation15_spill]] %s4321_s4 }
   0x4   :  { %4331 = sst [smem:[#allocation16_spill]] %s4323_s6 }
   0x5   :  { %11 = sst [smem:[#allocation3]] %s4322_s5 }
   0x6   :  { %12 = vsyncpa [#allocation5], 0 }
   0x7   :  { %14 = vsyncpa [#allocation5 + $0x1], 0 }
   0x8   :  { %15 = vsyncpa [#allocation7], 0 }
   0x9   :  { %17 = vsyncpa [#allocation7 + $0x1], 0  ;;  %s3183_s23 = smov 0   ;;  %s3185_s24 = smov 0  }
   0xa   :  { %s3187_s25 = smov 0   ;;  %s3189_s26 = smov 0  }
   0xb   :  { %s3191_s27 = smov 0   ;;  %s3193_s28 = smov 0  }
   0xc   :  { %s3195_s29 = smov 0   ;;  %s3197_s30 = smov 0  }
   0xd   :  { %s3199_s5 = smov 0   ;;  %s3201_s7 = smov 0  }
   0xe   :  { %s3203_s8 = smov 0  }
   0xf LB: > { %4332 = sst [smem:[#allocation10_spill]] %s3133_s7  ;;  %s2273_s9 = sadd.s32 4294967295, %s3137_s8   ;;  %s3137_s8 = sphi %s3203_s8, %s23_s8   ;;  %s3133_s7 = sphi %s3201_s7, %s4349_s7   ;;  %s3129_s5 = sphi %s3199_s5, %s4357_s5   ;;  %s3125_s30 = sphi %s3197_s30, %s4347_s30   ;;  %s3121_s29 = sphi %s3195_s29, %s4356_s29   ;;  %s3117_s28 = sphi %s3193_s28, %s4355_s28   ;;  %s3113_s27 = sphi %s3191_s27, %s4354_s27   ;;  %s3109_s26 = sphi %s3189_s26, %s4353_s26   ;;  %s3105_s25 = sphi %s3187_s25, %s4352_s25   ;;  %s3101_s24 = sphi %s3185_s24, %s4351_s24   ;;  %s3097_s23 = sphi %s3183_s23, %s4350_s23  }
  0x10   : > { %s35_s10 = sadd.s32 1, %s3133_s7  ;;  %p49_p0 = scmp.ne.s32.totalorder %s3117_s28, %s3113_s27 }
  0x11   : > { %p50_p1 = scmp.eq.s32.totalorder %s3137_s8, 0  ;;  %p55_p2 = scmp.ne.s32.totalorder %s3113_s27, %s3109_s26 }
  0x12   : > { %p3243_p3 = scmp.eq.s32.totalorder %s2273_s9, 0  ;;  %p2792_p5 = scmp.lt.s32.totalorder %s3137_s8, 4 }
  0x13   : > { %p51_p4 = por %p50_p1, %p49_p0  ;;  %s233_s14 = sand.u32 1, %s3117_s28  }
  0x14   : > { %p3252_p6 = por %p3243_p3, %p55_p2  ;;  %s2277_s15 = sshll.u32 %s233_s14, 8 }
  0x15   : > { %s2683_s16 = sshll.u32 %s3133_s7, 8  ;;  %s4335_s0 = sld [smem:[#allocation13_spill]] }
  0x16   : > { %s237_s20 = scalar_lea.vmem [#allocation4], %s2277_s15  ;;  %p2786_p7 = pnand %p2792_p5, %p51_p4 }
  0x17   : > { %s246_s21 = sshll.u32 %s237_s20, 4  ;;  %p2284_p8 = scmp.ge.s32.totalorder %s3137_s8, 1  ;;  %s247_s21 = int_to_ptr.vmem [resolvable:$true] %s246_s21 }
  0x18   : > { %s234_s26 = scalar_lea.sflag [#allocation5], %s233_s14  ;;  %s4324_s9 = smov 256  }
  0x19   : > { %p301_p9 = scmp.lt.s32.totalorder %s3137_s8, 5  ;;  %s32_s17 = sadd.s32 1, %s3129_s5 }
  0x1a   : > { %s94_s18 = sadd.s32 1, %s3105_s25  ;;  %p33_p11 = scmp.ge.s32.totalorder %s32_s17, 2 }
  0x1b   : > { %s243_s19 = scalar_lea.hbm %s4335_s0, %s2683_s16  ;;  %s3140_s16 = smov 16  }
  0x1c   : > { %s244_s22 = sshll.u32 %s243_s19, 4  ;;  %p3267_p10 = pnand %p2284_p8, %p301_p9  ;;  %s245_s22 = int_to_ptr.hbm [resolvable:$true] %s244_s22 }
  0x1d   : > { %2788 = dma.hbm_to_vmem [thread:$0]  (!%p2786_p7), %s245_s22, 4096, %s247_s21, %s234_s26, %s4324_s9, %s4324_s9, %s3140_s16  }
  0x1e   : > { %p101_p12 = scmp.ne.s32.totalorder %s3105_s25, %s3101_s24  ;;  %p107_p13 = scmp.ne.s32.totalorder %s3101_s24, %s3097_s23 }
  0x1f   : > { %s265_s14 = sand.u32 1, %s3105_s25   ;;  %s4359_s17 = smov (%p33_p11, %s32_s17), 0 }
  0x20   : > { %4337 = sst [smem:[#allocation11_spill]] %s4359_s17  ;;  %s4361_s10 = smov (!%p33_p11, %s35_s10), %s3133_s7 }
  0x21   : > { %s91_s19 = ssub.s32 %s3129_s5, %s4359_s17  ;;  %p3287_p0 = por %p101_p12, %p50_p1 }
  0x22   : > { %p37_p2 = scmp.ge.s32.totalorder %s4361_s10, 2  ;;  %p92_p4 = scmp.eq.s32.totalorder %s91_s19, 0 }
  0x23   : > { %p3293_p7 = por %p107_p13, %p3243_p3  ;;  %s2281_s26 = sshll.u32 %s265_s14, 9 }
  0x24   : > { %s4363_s10 = smov (%p37_p2, %s4361_s10), 0  ;;  %s2684_s16 = sshll.u32 %s3129_s5, 3 }
  0x25   : > { %4340 = sst [smem:[#allocation12_spill]] %s4363_s10  ;;  %s39_s22 = ssub.s32 %s3133_s7, %s4363_s10 }
  0x26   : > { %s3300_s21 = scalar_select %p92_p4, %s3105_s25, %s94_s18  }
  0x27   : > { %p40_p1 = scmp.eq.s32.totalorder %s39_s22, 0  ;;  %s269_s9 = scalar_lea.vmem [#allocation6], %s2281_s26 }
  0x28   : > { %s277_s11 = sshll.u32 %s269_s9, 4  ;;  %s4341_s0 = sadd.s32 1, %s3117_s28  ;;  %s278_s11 = int_to_ptr.vmem [resolvable:$true] %s277_s11 }
  0x29   : > { %s3308_s17 = scalar_select %p40_p1, %s3117_s28, %s4341_s0  }
  0x2a   : > { %s4342_s2 = sld [smem:[#allocation14_spill]]  ;;  %p2789_p3 = pnand %p2792_p5, %p3287_p0 }
  0x2b   : > { %s266_s18 = scalar_lea.sflag [#allocation7], %s265_s14  ;;  %s3141_s10 = smov 128  }
  0x2c   : > { %s3142_s7 = smov 8   ;;  %s4343_s22 = smov 256  }
  0x2d   : > { %s307_s0 = sand.u32 (!%p3267_p10), 1, %s3113_s27  }
  0x2e   : > { %305 = sbr.rel (%p3267_p10) target bundleno = 846 (0x34e), region = 44  ;;  %s2285_s9 = sshll.u32 (!%p3267_p10), %s307_s0, 8 }
  0x2f   : > { %s308_s26 = scalar_lea.sflag (!%p3267_p10), [#allocation5], %s307_s0 }
  0x30   : > { %s274_s6 = scalar_lea.hbm %s4342_s2, %s2684_s16  ;;  %s3321_s16 = scalar_lea.vmem (!%p3267_p10), [#allocation4], %s2285_s9 }
  0x31   : > { %s275_s4 = sshll.u32 %s274_s6, 4  ;;  %s276_s4 = int_to_ptr.hbm [resolvable:$true] %s275_s4 }
  0x32   : > { %2791 = dma.hbm_to_vmem [thread:$0]  (!%p2789_p3), %s276_s4, 8192, %s278_s11, %s266_s18, %s4343_s22, %s3141_s10, %s3142_s7  }
  0x33   : > { %3088 = dma.done.wait (%p3252_p6), %s308_s26, 4096  }
  0x34   : > { %3090 = vsyncadd (%p3252_p6), %s308_s26, 4294963200  ;;  %s317_s6 = sand.u32 1, %s3101_s24  }
  0x35   : > { %s2286_s14 = sshll.u32 %s317_s6, 9  ;;  %s318_s4 = scalar_lea.sflag [#allocation7], %s317_s6 }
  0x36   : > { %s3328_s7 = scalar_lea.vmem [#allocation6], %s2286_s14 }
  0x37   : > { %3092 = dma.done.wait (%p3293_p7), %s318_s4, 8192  }
  0x38   : > { %3094 = vsyncadd (%p3293_p7), %s318_s4, 4294959104  ;;  %s2287_s10 = sshll.u32 %s3125_s30, 4  ;;  %s2289_s11 = sshll.u32 %s3121_s29, 1 }
  0x39   : > { %p371_p5 = scmp.lt.s32.totalorder %s2287_s10, 31  ;;  %p378_p8 = scmp.lt.s32.totalorder %s2289_s11, 3 }
  0x3a   : > { %s4344_s9 = sld [smem:[#allocation15_spill]]  ;;  %p2293_p6 = scmp.ne.s32.totalorder %s3121_s29, 0 }
  0x3b   : > { %s4365_s10 = smov (!%p371_p5, %s2287_s10), 31  ;;  %s4367_s11 = smov (!%p378_p8, %s2289_s11), 3 }
  0x3c   : > { %s2288_s13 = sshll.u32 %s4365_s10, 3  ;;  %s380_s18 = scalar_lea.vmem %s4320_s3, %s4367_s11 }
  0x3d   : > { %s3341_s19 = scalar_lea.vmem %s4318_s1, %s2288_s13  ;;  %s4345_s4 = sld [smem:[#allocation16_spill]] }
  0x3f   : > { %396 = sbr.rel (%p2293_p6) target bundleno = 85 (0x55), region = 56 }
  0x40   : > { %s385_s26 = scalar_lea.vmem %s4344_s9, %s4367_s11 }
  0x43   : > { %s3354_s2 = scalar_lea.vmem %s4345_s4, %s2288_s13 }
  0x44   : > { %vm397_vm0 = vcmask 7168   ;;  %v3143_v0 = vmov 0.0  }
  0x45   : > { %398 = vst.msk [vmem:[#allocation2] sm:$0xff] %vm397_vm0, %v3143_v0 }
  0x46   : > { %399 = vst.msk [vmem:[#allocation2 + $0x8] sm:$0xff] %vm397_vm0, %v3143_v0 }
  0x47   : > { %400 = vst.msk [vmem:[#allocation2 + $0x10] sm:$0xff] %vm397_vm0, %v3143_v0 }
  0x48   : > { %401 = vst.msk [vmem:[#allocation2 + $0x18] sm:$0xff] %vm397_vm0, %v3143_v0 }
  0x49   : > { %402 = vst.msk [vmem:[#allocation2 + $0x20] sm:$0xff] %vm397_vm0, %v3143_v0 }
  0x4a   : > { %403 = vst.msk [vmem:[#allocation2 + $0x28] sm:$0xff] %vm397_vm0, %v3143_v0 }
  0x4b   : > { %404 = vst.msk [vmem:[#allocation2 + $0x30] sm:$0xff] %vm397_vm0, %v3143_v0 }
  0x4c   : > { %405 = vst.msk [vmem:[#allocation2 + $0x38] sm:$0xff] %vm397_vm0, %v3143_v0 }
  0x4d   : > { %406 = vst.msk [vmem:[#allocation2 + $0x40] sm:$0xff] %vm397_vm0, %v3143_v0 }
  0x4e   : > { %407 = vst.msk [vmem:[#allocation2 + $0x48] sm:$0xff] %vm397_vm0, %v3143_v0 }
  0x4f   : > { %408 = vst.msk [vmem:[#allocation2 + $0x50] sm:$0xff] %vm397_vm0, %v3143_v0 }
  0x50   : > { %409 = vst.msk [vmem:[#allocation2 + $0x58] sm:$0xff] %vm397_vm0, %v3143_v0 }
  0x51   : > { %410 = vst.msk [vmem:[#allocation2 + $0x60] sm:$0xff] %vm397_vm0, %v3143_v0 }
  0x52   : > { %411 = vst.msk [vmem:[#allocation2 + $0x68] sm:$0xff] %vm397_vm0, %v3143_v0 }
  0x53   : > { %412 = vst.msk [vmem:[#allocation2 + $0x70] sm:$0xff] %vm397_vm0, %v3143_v0 }
  0x54   : > { %413 = vst.msk [vmem:[#allocation2 + $0x78] sm:$0xff] %vm397_vm0, %v3143_v0 }
  0x55 PF: > { %v2480_v1 = vld [vmem:[%s3328_s7 + $0x70] sm:$0xf]  ;;  %v2732_v2 = vld [vmem:[%s3328_s7 + $0x74] sm:$0xf0]  ;;  %v2472_v12 = vld [vmem:[%s3328_s7 + $0x60] sm:$0xf] }
  0x56   : > { %v2544_v3 = vld [vmem:[%s3328_s7 + $0xf0] sm:$0xf]  ;;  %v2481_v4 = vor.u32 %v2732_v2, %v2480_v1  ;;  %v2748_v5 = vld [vmem:[%s3328_s7 + $0xf4] sm:$0xf0]  ;;  %v2730_v14 = vld [vmem:[%s3328_s7 + $0x64] sm:$0xf0] }
  0x57   : > { %v2608_v6 = vld [vmem:[%s3328_s7 + $0x170] sm:$0xf]  ;;  %v2764_v7 = vld [vmem:[%s3328_s7 + $0x174] sm:$0xf0]  ;;  %v2545_v8 = vor.u32 %v2748_v5, %v2544_v3  ;;  %v2536_v15 = vld [vmem:[%s3328_s7 + $0xe0] sm:$0xf]  ;;  %v2473_v17 = vor.u32 %v2730_v14, %v2472_v12 }
  0x58   : > { %v2609_v9 = vor.u32 %v2764_v7, %v2608_v6  ;;  %v2672_v10 = vld [vmem:[%s3328_s7 + $0x1f0] sm:$0xf]  ;;  %v2780_v11 = vld [vmem:[%s3328_s7 + $0x1f4] sm:$0xf0]  ;;  %996 = vmatpush.bf16.msra.mxu0 %v2481_v4  ;;  %v2746_v16 = vld [vmem:[%s3328_s7 + $0xe4] sm:$0xf0] }
  0x59   : > { %v2673_v13 = vor.u32 %v2780_v11, %v2672_v10  ;;  %1045 = vmatpush.bf16.msra.mxu1 %v2545_v8  ;;  %v2537_v18 = vor.u32 %v2746_v16, %v2536_v15  ;;  %v2600_v19 = vld [vmem:[%s3328_s7 + $0x160] sm:$0xf]  ;;  %v2762_v20 = vld [vmem:[%s3328_s7 + $0x164] sm:$0xf0]  ;;  %v2464_v24 = vld [vmem:[%s3328_s7 + $0x50] sm:$0xf] }
  0x5a   : > { %1094 = vmatpush.bf16.msra.mxu2 %v2609_v9  ;;  %v2664_v21 = vld [vmem:[%s3328_s7 + $0x1e0] sm:$0xf]  ;;  %v2601_v22 = vor.u32 %v2762_v20, %v2600_v19  ;;  %v2778_v23 = vld [vmem:[%s3328_s7 + $0x1e4] sm:$0xf0]  ;;  %v2728_v25 = vld [vmem:[%s3328_s7 + $0x54] sm:$0xf0] }
  0x5b   : > { %1143 = vmatpush.bf16.msra.mxu3 %v2673_v13  ;;  %v2665_v26 = vor.u32 %v2778_v23, %v2664_v21  ;;  %v2528_v27 = vld [vmem:[%s3328_s7 + $0xd0] sm:$0xf]  ;;  %v2744_v28 = vld [vmem:[%s3328_s7 + $0xd4] sm:$0xf0]  ;;  %v2465_v30 = vor.u32 %v2728_v25, %v2464_v24  ;;  %v2456_v36 = vld [vmem:[%s3328_s7 + $0x40] sm:$0xf] }
  0x5c   : > { %v2592_v29 = vld [vmem:[%s3328_s7 + $0x150] sm:$0xf]  ;;  %997 = vmatpush.bf16.msra.mxu0 %v2473_v17  ;;  %v2760_v31 = vld [vmem:[%s3328_s7 + $0x154] sm:$0xf0]  ;;  %v2529_v34 = vor.u32 %v2744_v28, %v2528_v27  ;;  %v2726_v37 = vld [vmem:[%s3328_s7 + $0x44] sm:$0xf0] }
  0x5d   : > { %v2656_v32 = vld [vmem:[%s3328_s7 + $0x1d0] sm:$0xf]  ;;  %v2776_v33 = vld [vmem:[%s3328_s7 + $0x1d4] sm:$0xf0]  ;;  %1046 = vmatpush.bf16.msra.mxu1 %v2537_v18  ;;  %v2593_v35 = vor.u32 %v2760_v31, %v2592_v29  ;;  %v2520_v38 = vld [vmem:[%s3328_s7 + $0xc0] sm:$0xf]  ;;  %v2457_v45 = vor.u32 %v2726_v37, %v2456_v36 }
  0x5e   : > { %1095 = vmatpush.bf16.msra.mxu2 %v2601_v22  ;;  %v2657_v39 = vor.u32 %v2776_v33, %v2656_v32  ;;  %v2742_v40 = vld [vmem:[%s3328_s7 + $0xc4] sm:$0xf0]  ;;  %v2584_v41 = vld [vmem:[%s3328_s7 + $0x140] sm:$0xf]  ;;  %v2448_v48 = vld [vmem:[%s3328_s7 + $0x30] sm:$0xf] }
  0x5f   : > { %1144 = vmatpush.bf16.msra.mxu3 %v2665_v26  ;;  %v2758_v42 = vld [vmem:[%s3328_s7 + $0x144] sm:$0xf0]  ;;  %v2648_v43 = vld [vmem:[%s3328_s7 + $0x1c0] sm:$0xf]  ;;  %v2521_v46 = vor.u32 %v2742_v40, %v2520_v38  ;;  %v2724_v49 = vld [vmem:[%s3328_s7 + $0x34] sm:$0xf0] }
  0x60   : > { %v2774_v44 = vld [vmem:[%s3328_s7 + $0x1c4] sm:$0xf0]  ;;  %998 = vmatpush.bf16.msra.mxu0 %v2465_v30  ;;  %v2585_v47 = vor.u32 %v2758_v42, %v2584_v41  ;;  %v2512_v50 = vld [vmem:[%s3328_s7 + $0xb0] sm:$0xf]  ;;  %v2740_v52 = vld [vmem:[%s3328_s7 + $0xb4] sm:$0xf0]  ;;  %v2449_v57 = vor.u32 %v2724_v49, %v2448_v48 }
  0x61   : > { %1047 = vmatpush.bf16.msra.mxu1 %v2529_v34  ;;  %v2649_v51 = vor.u32 %v2774_v44, %v2648_v43  ;;  %v2576_v53 = vld [vmem:[%s3328_s7 + $0x130] sm:$0xf]  ;;  %v2756_v54 = vld [vmem:[%s3328_s7 + $0x134] sm:$0xf0]  ;;  %v2513_v58 = vor.u32 %v2740_v52, %v2512_v50  ;;  %v2440_v60 = vld [vmem:[%s3328_s7 + $0x20] sm:$0xf] }
  0x62   : > { %1096 = vmatpush.bf16.msra.mxu2 %v2593_v35  ;;  %v2640_v55 = vld [vmem:[%s3328_s7 + $0x1b0] sm:$0xf]  ;;  %v2772_v56 = vld [vmem:[%s3328_s7 + $0x1b4] sm:$0xf0]  ;;  %v2577_v59 = vor.u32 %v2756_v54, %v2576_v53  ;;  %v2722_v61 = vld [vmem:[%s3328_s7 + $0x24] sm:$0xf0] }
  0x63   : > { %1145 = vmatpush.bf16.msra.mxu3 %v2657_v39  ;;  %v2504_v62 = vld [vmem:[%s3328_s7 + $0xa0] sm:$0xf]  ;;  %v2641_v63 = vor.u32 %v2772_v56, %v2640_v55  ;;  %v2738_v0 = vld [vmem:[%s3328_s7 + $0xa4] sm:$0xf0]  ;;  %v2441_v5 = vor.u32 %v2722_v61, %v2440_v60  ;;  %v2432_v8 = vld [vmem:[%s3328_s7 + $0x10] sm:$0xf] }
  0x64   : > { %999 = vmatpush.bf16.msra.mxu0 %v2457_v45  ;;  %v2568_v1 = vld [vmem:[%s3328_s7 + $0x120] sm:$0xf]  ;;  %v2754_v2 = vld [vmem:[%s3328_s7 + $0x124] sm:$0xf0]  ;;  %v2505_v6 = vor.u32 %v2738_v0, %v2504_v62  ;;  %v2720_v9 = vld [vmem:[%s3328_s7 + $0x14] sm:$0xf0] }
  0x65   : > { %1048 = vmatpush.bf16.msra.mxu1 %v2521_v46  ;;  %v2632_v3 = vld [vmem:[%s3328_s7 + $0x1a0] sm:$0xf]  ;;  %v2770_v4 = vld [vmem:[%s3328_s7 + $0x1a4] sm:$0xf0]  ;;  %v2569_v7 = vor.u32 %v2754_v2, %v2568_v1  ;;  %v2496_v10 = vld [vmem:[%s3328_s7 + $0x90] sm:$0xf]  ;;  %v2433_v18 = vor.u32 %v2720_v9, %v2432_v8 }
  0x66   : > { %1097 = vmatpush.bf16.msra.mxu2 %v2585_v47  ;;  %v2633_v11 = vor.u32 %v2770_v4, %v2632_v3  ;;  %v2736_v12 = vld [vmem:[%s3328_s7 + $0x94] sm:$0xf0]  ;;  %v2560_v13 = vld [vmem:[%s3328_s7 + $0x110] sm:$0xf]  ;;  %v2424_v17 = vld [vmem:[%s3328_s7] sm:$0xf] }
  0x67   : > { %1146 = vmatpush.bf16.msra.mxu3 %v2649_v51  ;;  %v2752_v14 = vld [vmem:[%s3328_s7 + $0x114] sm:$0xf0]  ;;  %v2624_v15 = vld [vmem:[%s3328_s7 + $0x190] sm:$0xf]  ;;  %v2718_v19 = vld [vmem:[%s3328_s7 + $0x4] sm:$0xf0]  ;;  %v2497_v22 = vor.u32 %v2736_v12, %v2496_v10 }
  0x68   : > { %1000 = vmatpush.bf16.msra.mxu0 %v2449_v57  ;;  %v2768_v16 = vld [vmem:[%s3328_s7 + $0x194] sm:$0xf0]  ;;  %v2488_v20 = vld [vmem:[%s3328_s7 + $0x80] sm:$0xf]  ;;  %v2734_v21 = vld [vmem:[%s3328_s7 + $0x84] sm:$0xf0]  ;;  %v2561_v23 = vor.u32 %v2752_v14, %v2560_v13  ;;  %v2425_v35 = vor.u32 %v2718_v19, %v2424_v17 }
  0x69   : > { %1049 = vmatpush.bf16.msra.mxu1 %v2513_v58  ;;  %v2552_v24 = vld [vmem:[%s3328_s7 + $0x100] sm:$0xf]  ;;  %v2750_v25 = vld [vmem:[%s3328_s7 + $0x104] sm:$0xf0]  ;;  %v2625_v27 = vor.u32 %v2768_v16, %v2624_v15  ;;  %v2687_v30 = vld [vmem:[%s3321_s16 + $0xc] sm:$0xf0]  ;;  %v2489_v39 = vor.u32 %v2734_v21, %v2488_v20 }
  0x6a   : > { %1098 = vmatpush.bf16.msra.mxu2 %v2577_v59  ;;  %v2616_v26 = vld [vmem:[%s3328_s7 + $0x180] sm:$0xf]  ;;  %v2766_v28 = vld [vmem:[%s3328_s7 + $0x184] sm:$0xf0]  ;;  %v2685_v31 = vld [vmem:[%s3321_s16 + $0x4] sm:$0xf]  ;;  %v2553_v40 = vor.u32 %v2750_v25, %v2552_v24 }
  0x6b   : > { %1147 = vmatpush.bf16.msra.mxu3 %v2641_v63  ;;  %v2296_v29 = vld [vmem:[%s3321_s16] sm:$0xf]  ;;  %v2298_v32 = vld [vmem:[%s3321_s16 + $0x10] sm:$0xf0]  ;;  %v2610_v34 = vld [vmem:[%s3328_s7 + $0x178] sm:$0xf0]  ;;  %v2617_v44 = vor.u32 %v2766_v28, %v2616_v26 }
  0x6c   : > { %1001 = vmatpush.bf16.msra.mxu0 %v2441_v5  ;;  %v2763_v33 = vld [vmem:[%s3328_s7 + $0x174] sm:$0xf]  ;;  %v2304_v36 = vld [vmem:[%s3321_s16 + $0x8] sm:$0xf]  ;;  %v2674_v38 = vld [vmem:[%s3328_s7 + $0x1f8] sm:$0xf0]  ;;  %v3452_v49 = vor.u32 %v2687_v30, %v2296_v29  ;;  %v3457_v54 = vor.u32 %v2685_v31, %v2298_v32 }
  0x6d   : > { %1050 = vmatpush.bf16.msra.mxu1 %v2505_v6  ;;  %v2779_v37 = vld [vmem:[%s3328_s7 + $0x1f4] sm:$0xf]  ;;  %v2688_v41 = vld [vmem:[%s3321_s16 + $0x14] sm:$0xf0]  ;;  %v2686_v42 = vld [vmem:[%s3321_s16 + $0xc] sm:$0xf]  ;;  %v2613_v45 = vor.u32 %v2763_v33, %v2610_v34 }
  0x6e   : > { %1099 = vmatpush.bf16.msra.mxu2 %v2569_v7  ;;  %v2306_v43 = vld [vmem:[%s3321_s16 + $0x18] sm:$0xf0]  ;;  %v2731_v46 = vld [vmem:[%s3328_s7 + $0x74] sm:$0xf]  ;;  %v2677_v50 = vor.u32 %v2779_v37, %v2674_v38  ;;  %v2761_v52 = vld [vmem:[%s3328_s7 + $0x164] sm:$0xf]  ;;  %v3459_v55 = vor.u32 %v2688_v41, %v2304_v36 }
  0x6f   : > { %1148 = vmatpush.bf16.msra.mxu3 %v2633_v11  ;;  %v2482_v47 = vld [vmem:[%s3328_s7 + $0x78] sm:$0xf0]  ;;  %v2747_v48 = vld [vmem:[%s3328_s7 + $0xf4] sm:$0xf]  ;;  %v2602_v53 = vld [vmem:[%s3328_s7 + $0x168] sm:$0xf0]  ;;  %v3463_v58 = vor.u32 %v2686_v42, %v2306_v43 }
  0x70   : > { %1002 = vmatpush.bf16.msra.mxu0 %v2433_v18  ;;  %v2546_v51 = vld [vmem:[%s3328_s7 + $0xf8] sm:$0xf0]  ;;  %v2777_v56 = vld [vmem:[%s3328_s7 + $0x1e4] sm:$0xf]  ;;  %v2666_v57 = vld [vmem:[%s3328_s7 + $0x1e8] sm:$0xf0]  ;;  %v2485_v59 = vor.u32 %v2731_v46, %v2482_v47  ;;  %v2605_v61 = vor.u32 %v2761_v52, %v2602_v53 }
  0x71   : > { %1051 = vmatpush.bf16.msra.mxu1 %v2497_v22  ;;  %v2549_v60 = vor.u32 %v2747_v48, %v2546_v51  ;;  %v2729_v62 = vld [vmem:[%s3328_s7 + $0x64] sm:$0xf]  ;;  %v2474_v63 = vld [vmem:[%s3328_s7 + $0x68] sm:$0xf0]  ;;  %v2669_v0 = vor.u32 %v2777_v56, %v2666_v57  ;;  %v2759_v4 = vld [vmem:[%s3328_s7 + $0x154] sm:$0xf] }
  0x72   : > { %1100 = vmatpush.bf16.msra.mxu2 %v2561_v23  ;;  %v2745_v1 = vld [vmem:[%s3328_s7 + $0xe4] sm:$0xf]  ;;  %v2538_v2 = vld [vmem:[%s3328_s7 + $0xe8] sm:$0xf0]  ;;  %v2477_v3 = vor.u32 %v2729_v62, %v2474_v63  ;;  %v2594_v5 = vld [vmem:[%s3328_s7 + $0x158] sm:$0xf0] }
  0x73   : > { %1149 = vmatpush.bf16.msra.mxu3 %v2625_v27  ;;  %v2727_v6 = vld [vmem:[%s3328_s7 + $0x54] sm:$0xf]  ;;  %v2541_v7 = vor.u32 %v2745_v1, %v2538_v2  ;;  %v2597_v8 = vor.u32 %v2759_v4, %v2594_v5  ;;  %v2466_v9 = vld [vmem:[%s3328_s7 + $0x58] sm:$0xf0]  ;;  %v2312_v17 = vld [vmem:[%s3321_s16 + $0x20] sm:$0xf] }
  0x74   : > { %1003 = vmatpush.bf16.msra.mxu0 %v2425_v35  ;;  %v2775_v10 = vld [vmem:[%s3328_s7 + $0x1d4] sm:$0xf]  ;;  %v2658_v11 = vld [vmem:[%s3328_s7 + $0x1d8] sm:$0xf0]  ;;  %v2469_v15 = vor.u32 %v2727_v6, %v2466_v9  ;;  %v2691_v18 = vld [vmem:[%s3321_s16 + $0x2c] sm:$0xf0] }
  0x75   : > { %1052 = vmatpush.bf16.msra.mxu1 %v2489_v39  ;;  %v2661_v12 = vor.u32 %v2775_v10, %v2658_v11  ;;  %v2743_v13 = vld [vmem:[%s3328_s7 + $0xd4] sm:$0xf]  ;;  %v2530_v14 = vld [vmem:[%s3328_s7 + $0xd8] sm:$0xf0]  ;;  %v2689_v19 = vld [vmem:[%s3321_s16 + $0x24] sm:$0xf]  ;;  %v3489_v25 = vor.u32 %v2691_v18, %v2312_v17 }
  0x76   : > { %1101 = vmatpush.bf16.msra.mxu2 %v2553_v40  ;;  %v2533_v16 = vor.u32 %v2743_v13, %v2530_v14  ;;  %v2314_v20 = vld [vmem:[%s3321_s16 + $0x30] sm:$0xf0]  ;;  %v2320_v21 = vld [vmem:[%s3321_s16 + $0x28] sm:$0xf]  ;;  %v2692_v22 = vld [vmem:[%s3321_s16 + $0x34] sm:$0xf0] }
  0x77   : > { %1150 = vmatpush.bf16.msra.mxu3 %v2617_v44  ;;  %1004 = vmatmul.bf16.vlgmr.msra.gmra.mxu0 %v3452_v49  ;;  %v2690_v23 = vld [vmem:[%s3321_s16 + $0x2c] sm:$0xf]  ;;  %v2322_v24 = vld [vmem:[%s3321_s16 + $0x38] sm:$0xf0]  ;;  %v3491_v26 = vor.u32 %v2689_v19, %v2314_v20  ;;  %v3493_v27 = vor.u32 %v2692_v22, %v2320_v21  ;;  %v2757_v29 = vld [vmem:[%s3328_s7 + $0x144] sm:$0xf] }
  0x78   : > { %1053 = vmatmul.bf16.vlgmr.msra.gmra.mxu1 %v3457_v54  ;;  %1192 = vmatpush.bf16.msrb.mxu0 %v2485_v59  ;;  %v3495_v28 = vor.u32 %v2690_v23, %v2322_v24  ;;  %v2586_v30 = vld [vmem:[%s3328_s7 + $0x148] sm:$0xf0]  ;;  %v2725_v31 = vld [vmem:[%s3328_s7 + $0x44] sm:$0xf]  ;;  %v2328_v41 = vld [vmem:[%s3321_s16 + $0x40] sm:$0xf] }
  0x79   : > { %1102 = vmatmul.bf16.vlgmr.msra.gmra.mxu2 %v3459_v55  ;;  %1241 = vmatpush.bf16.msrb.mxu1 %v2549_v60  ;;  %v2589_v32 = vor.u32 %v2757_v29, %v2586_v30  ;;  %v2458_v33 = vld [vmem:[%s3328_s7 + $0x48] sm:$0xf0]  ;;  %v2773_v34 = vld [vmem:[%s3328_s7 + $0x1c4] sm:$0xf]  ;;  %v2695_v42 = vld [vmem:[%s3321_s16 + $0x4c] sm:$0xf0] }
  0x7a   : > { %1290 = vmatpush.bf16.msrb.mxu2 %v2613_v45  ;;  %1151 = vmatmul.bf16.vlgmr.msra.gmra.mxu3 %v3463_v58  ;;  %v2650_v35 = vld [vmem:[%s3328_s7 + $0x1c8] sm:$0xf0]  ;;  %v2461_v36 = vor.u32 %v2725_v31, %v2458_v33  ;;  %v2741_v38 = vld [vmem:[%s3328_s7 + $0xc4] sm:$0xf]  ;;  %v2330_v44 = vld [vmem:[%s3321_s16 + $0x50] sm:$0xf0] }
  0x7b   : > { %1339 = vmatpush.bf16.msrb.mxu3 %v2677_v50  ;;  %v2653_v37 = vor.u32 %v2773_v34, %v2650_v35  ;;  %v2522_v39 = vld [vmem:[%s3328_s7 + $0xc8] sm:$0xf0]  ;;  %v2693_v43 = vld [vmem:[%s3321_s16 + $0x44] sm:$0xf]  ;;  %v2336_v45 = vld [vmem:[%s3321_s16 + $0x48] sm:$0xf]  ;;  %v3517_v50 = vor.u32 %v2695_v42, %v2328_v41 }
  0x7c   : > { %1193 = vmatpush.bf16.msrb.mxu0 %v2477_v3  ;;  %v2525_v40 = vor.u32 %v2741_v38, %v2522_v39  ;;  %v2696_v46 = vld [vmem:[%s3321_s16 + $0x54] sm:$0xf0]  ;;  %v2694_v47 = vld [vmem:[%s3321_s16 + $0x4c] sm:$0xf]  ;;  %v2338_v48 = vld [vmem:[%s3321_s16 + $0x58] sm:$0xf0]  ;;  %v3519_v51 = vor.u32 %v2693_v43, %v2330_v44 }
  0x7d   : > { %1242 = vmatpush.bf16.msrb.mxu1 %v2541_v7  ;;  %v3521_v52 = vor.u32 %v2696_v46, %v2336_v45  ;;  %v3523_v53 = vor.u32 %v2694_v47, %v2338_v48  ;;  %v2755_v56 = vld [vmem:[%s3328_s7 + $0x134] sm:$0xf]  ;;  %v2578_v57 = vld [vmem:[%s3328_s7 + $0x138] sm:$0xf0]  ;;  %v2344_v5 = vld [vmem:[%s3321_s16 + $0x60] sm:$0xf] }
  0x7e   : > { %1291 = vmatpush.bf16.msrb.mxu2 %v2605_v61  ;;  %v2723_v59 = vld [vmem:[%s3328_s7 + $0x34] sm:$0xf]  ;;  %v2581_v60 = vor.u32 %v2755_v56, %v2578_v57  ;;  %v2450_v61 = vld [vmem:[%s3328_s7 + $0x38] sm:$0xf0]  ;;  %v2699_v6 = vld [vmem:[%s3321_s16 + $0x6c] sm:$0xf0] }
  0x7f   : > { %1340 = vmatpush.bf16.msrb.mxu3 %v2669_v0  ;;  %v2771_v62 = vld [vmem:[%s3328_s7 + $0x1b4] sm:$0xf]  ;;  %v2642_v63 = vld [vmem:[%s3328_s7 + $0x1b8] sm:$0xf0]  ;;  %v2453_v0 = vor.u32 %v2723_v59, %v2450_v61  ;;  %v2697_v7 = vld [vmem:[%s3321_s16 + $0x64] sm:$0xf]  ;;  %v3545_v13 = vor.u32 %v2699_v6, %v2344_v5 }
  0x80   : > { %1194 = vmatpush.bf16.msrb.mxu0 %v2469_v15  ;;  %v2645_v1 = vor.u32 %v2771_v62, %v2642_v63  ;;  %v2739_v2 = vld [vmem:[%s3328_s7 + $0xb4] sm:$0xf]  ;;  %v2514_v3 = vld [vmem:[%s3328_s7 + $0xb8] sm:$0xf0]  ;;  %v2352_v9 = vld [vmem:[%s3321_s16 + $0x68] sm:$0xf] }
  0x81   : > { %1243 = vmatpush.bf16.msrb.mxu1 %v2533_v16  ;;  %v2517_v4 = vor.u32 %v2739_v2, %v2514_v3  ;;  %v2700_v10 = vld [vmem:[%s3321_s16 + $0x74] sm:$0xf0]  ;;  %v2698_v11 = vld [vmem:[%s3321_s16 + $0x6c] sm:$0xf]  ;;  %v2753_v17 = vld [vmem:[%s3328_s7 + $0x124] sm:$0xf] }
  0x82   : > { %1292 = vmatpush.bf16.msrb.mxu2 %v2597_v8  ;;  %v2346_v8 = vld [vmem:[%s3321_s16 + $0x70] sm:$0xf0]  ;;  %v3549_v15 = vor.u32 %v2700_v10, %v2352_v9  ;;  %v2570_v18 = vld [vmem:[%s3328_s7 + $0x128] sm:$0xf0]  ;;  %v2721_v19 = vld [vmem:[%s3328_s7 + $0x24] sm:$0xf] }
  0x83   : > { %1341 = vmatpush.bf16.msrb.mxu3 %v2661_v12  ;;  %v2354_v12 = vld [vmem:[%s3321_s16 + $0x78] sm:$0xf0]  ;;  %v3547_v14 = vor.u32 %v2697_v7, %v2346_v8  ;;  %v2573_v20 = vor.u32 %v2753_v17, %v2570_v18  ;;  %v2442_v21 = vld [vmem:[%s3328_s7 + $0x28] sm:$0xf0]  ;;  %v2769_v22 = vld [vmem:[%s3328_s7 + $0x1a4] sm:$0xf] }
  0x84   : > { %1195 = vmatpush.bf16.msrb.mxu0 %v2461_v36  ;;  %v3551_v16 = vor.u32 %v2698_v11, %v2354_v12  ;;  %v2634_v23 = vld [vmem:[%s3328_s7 + $0x1a8] sm:$0xf0]  ;;  %v2445_v24 = vor.u32 %v2721_v19, %v2442_v21  ;;  %v2737_v30 = vld [vmem:[%s3328_s7 + $0xa4] sm:$0xf]  ;;  %v2360_v33 = vld [vmem:[%s3321_s16 + $0x80] sm:$0xf] }
  0x85   : > { %1244 = vmatpush.bf16.msrb.mxu1 %v2525_v40  ;;  %v2637_v29 = vor.u32 %v2769_v22, %v2634_v23  ;;  %v2506_v31 = vld [vmem:[%s3328_s7 + $0xa8] sm:$0xf0]  ;;  %v2703_v34 = vld [vmem:[%s3321_s16 + $0x8c] sm:$0xf0]  ;;  %v2701_v35 = vld [vmem:[%s3321_s16 + $0x84] sm:$0xf] }
  0x86   : > { %1293 = vmatpush.bf16.msrb.mxu2 %v2589_v32  ;;  %v2509_v32 = vor.u32 %v2737_v30, %v2506_v31  ;;  %v2362_v36 = vld [vmem:[%s3321_s16 + $0x90] sm:$0xf0]  ;;  %v2704_v38 = vld [vmem:[%s3321_s16 + $0x94] sm:$0xf0]  ;;  %v2702_v39 = vld [vmem:[%s3321_s16 + $0x8c] sm:$0xf]  ;;  %v3573_v41 = vor.u32 %v2703_v34, %v2360_v33 }
  0x87   : > { %1009 = vmatmul.bf16.gmra.mxu0 %v3489_v25  ;;  %1342 = vmatpush.bf16.msrb.mxu3 %v2653_v37  ;;  %v2368_v37 = vld [vmem:[%s3321_s16 + $0x88] sm:$0xf]  ;;  %v2370_v40 = vld [vmem:[%s3321_s16 + $0x98] sm:$0xf0]  ;;  %v3575_v42 = vor.u32 %v2701_v35, %v2362_v36  ;;  %v2751_v45 = vld [vmem:[%s3328_s7 + $0x114] sm:$0xf] }
  0x88   : > { %1058 = vmatmul.bf16.gmra.mxu1 %v3491_v26  ;;  %1196 = vmatpush.bf16.msrb.mxu0 %v2453_v0  ;;  %v3577_v43 = vor.u32 %v2704_v38, %v2368_v37  ;;  %v3579_v44 = vor.u32 %v2702_v39, %v2370_v40  ;;  %v2562_v46 = vld [vmem:[%s3328_s7 + $0x118] sm:$0xf0]  ;;  %v2719_v47 = vld [vmem:[%s3328_s7 + $0x14] sm:$0xf]  ;;  %v2707_v2 = vld [vmem:[%s3321_s16 + $0xac] sm:$0xf0] }
  0x89   : > { %1107 = vmatmul.bf16.gmra.mxu2 %v3493_v27  ;;  %1245 = vmatpush.bf16.msrb.mxu1 %v2517_v4  ;;  %v2565_v48 = vor.u32 %v2751_v45, %v2562_v46  ;;  %v2434_v56 = vld [vmem:[%s3328_s7 + $0x18] sm:$0xf0]  ;;  %v2767_v57 = vld [vmem:[%s3328_s7 + $0x194] sm:$0xf]  ;;  %v2705_v3 = vld [vmem:[%s3321_s16 + $0xa4] sm:$0xf] }
  0x8a   : > { %1156 = vmatmul.bf16.gmra.mxu3 %v3495_v28  ;;  %1294 = vmatpush.bf16.msrb.mxu2 %v2581_v60  ;;  %v2626_v59 = vld [vmem:[%s3328_s7 + $0x198] sm:$0xf0]  ;;  %v2437_v60 = vor.u32 %v2719_v47, %v2434_v56  ;;  %v2735_v62 = vld [vmem:[%s3328_s7 + $0x94] sm:$0xf]  ;;  %v2384_v5 = vld [vmem:[%s3321_s16 + $0xa8] sm:$0xf] }
  0x8b   : > { %1343 = vmatpush.bf16.msrb.mxu3 %v2645_v1  ;;  %v2629_v61 = vor.u32 %v2767_v57, %v2626_v59  ;;  %v2498_v63 = vld [vmem:[%s3328_s7 + $0x98] sm:$0xf0]  ;;  %v2376_v1 = vld [vmem:[%s3321_s16 + $0xa0] sm:$0xf]  ;;  %v2378_v4 = vld [vmem:[%s3321_s16 + $0xb0] sm:$0xf0] }
  0x8c   : > { %1197 = vmatpush.bf16.msrb.mxu0 %v2445_v24  ;;  %v2501_v0 = vor.u32 %v2735_v62, %v2498_v63  ;;  %v2708_v6 = vld [vmem:[%s3321_s16 + $0xb4] sm:$0xf0]  ;;  %v2706_v7 = vld [vmem:[%s3321_s16 + $0xac] sm:$0xf]  ;;  %v2386_v8 = vld [vmem:[%s3321_s16 + $0xb8] sm:$0xf0]  ;;  %v3601_v9 = vor.u32 %v2707_v2, %v2376_v1  ;;  %v3603_v10 = vor.u32 %v2705_v3, %v2378_v4 }
  0x8d   : > { %1246 = vmatpush.bf16.msrb.mxu1 %v2509_v32  ;;  %v3605_v11 = vor.u32 %v2708_v6, %v2384_v5  ;;  %v3607_v12 = vor.u32 %v2706_v7, %v2386_v8  ;;  %v2749_v17 = vld [vmem:[%s3328_s7 + $0x104] sm:$0xf]  ;;  %v2554_v18 = vld [vmem:[%s3328_s7 + $0x108] sm:$0xf0]  ;;  %v2392_v33 = vld [vmem:[%s3321_s16 + $0xc0] sm:$0xf] }
  0x8e   : > { %1295 = vmatpush.bf16.msrb.mxu2 %v2573_v20  ;;  %v2717_v19 = vld [vmem:[%s3328_s7 + $0x4] sm:$0xf]  ;;  %v2557_v20 = vor.u32 %v2749_v17, %v2554_v18  ;;  %v2426_v21 = vld [vmem:[%s3328_s7 + $0x8] sm:$0xf0]  ;;  %v2711_v34 = vld [vmem:[%s3321_s16 + $0xcc] sm:$0xf0] }
  0x8f   : > { %1344 = vmatpush.bf16.msrb.mxu3 %v2637_v29  ;;  %v2765_v22 = vld [vmem:[%s3328_s7 + $0x184] sm:$0xf]  ;;  %v2618_v23 = vld [vmem:[%s3328_s7 + $0x188] sm:$0xf0]  ;;  %v2429_v24 = vor.u32 %v2717_v19, %v2426_v21  ;;  %v2394_v36 = vld [vmem:[%s3321_s16 + $0xd0] sm:$0xf0]  ;;  %v3629_v45 = vor.u32 %v2711_v34, %v2392_v33 }
  0x90   : > { %1198 = vmatpush.bf16.msrb.mxu0 %v2437_v60  ;;  %v2621_v29 = vor.u32 %v2765_v22, %v2618_v23  ;;  %v2733_v30 = vld [vmem:[%s3328_s7 + $0x84] sm:$0xf]  ;;  %v2490_v31 = vld [vmem:[%s3328_s7 + $0x88] sm:$0xf0]  ;;  %v2400_v37 = vld [vmem:[%s3321_s16 + $0xc8] sm:$0xf] }
  0x91   : > { %1247 = vmatpush.bf16.msrb.mxu1 %v2501_v0  ;;  %v2493_v32 = vor.u32 %v2733_v30, %v2490_v31  ;;  %v2709_v35 = vld [vmem:[%s3321_s16 + $0xc4] sm:$0xf]  ;;  %v2712_v38 = vld [vmem:[%s3321_s16 + $0xd4] sm:$0xf0]  ;;  %v2710_v39 = vld [vmem:[%s3321_s16 + $0xcc] sm:$0xf] }
  0x92   : > { %1296 = vmatpush.bf16.msrb.mxu2 %v2565_v48  ;;  %v2402_v40 = vld [vmem:[%s3321_s16 + $0xd8] sm:$0xf0]  ;;  %v3631_v46 = vor.u32 %v2709_v35, %v2394_v36  ;;  %v3633_v47 = vor.u32 %v2712_v38, %v2400_v37  ;;  %v2408_v56 = vld [vmem:[%s3321_s16 + $0xe0] sm:$0xf]  ;;  %v2715_v57 = vld [vmem:[%s3321_s16 + $0xec] sm:$0xf0] }
  0x93   : > { %1345 = vmatpush.bf16.msrb.mxu3 %v2629_v61  ;;  %v3635_v48 = vor.u32 %v2710_v39, %v2402_v40  ;;  %v2713_v59 = vld [vmem:[%s3321_s16 + $0xe4] sm:$0xf]  ;;  %v2410_v60 = vld [vmem:[%s3321_s16 + $0xf0] sm:$0xf0]  ;;  %v2416_v61 = vld [vmem:[%s3321_s16 + $0xe8] sm:$0xf]  ;;  %v3649_v1 = vor.u32 %v2715_v57, %v2408_v56 }
  0x94   : > { %1199 = vmatpush.bf16.msrb.mxu0 %v2429_v24  ;;  %v2716_v62 = vld [vmem:[%s3321_s16 + $0xf4] sm:$0xf0]  ;;  %v2714_v63 = vld [vmem:[%s3321_s16 + $0xec] sm:$0xf]  ;;  %v2418_v0 = vld [vmem:[%s3321_s16 + $0xf8] sm:$0xf0]  ;;  %v3651_v2 = vor.u32 %v2713_v59, %v2410_v60 }
  0x95   : > { %1248 = vmatpush.bf16.msrb.mxu1 %v2493_v32  ;;  %v3653_v3 = vor.u32 %v2716_v62, %v2416_v61  ;;  %v3655_v4 = vor.u32 %v2714_v63, %v2418_v0  ;;  %v3666_v5 = vld [vmem:[%s380_s18] sm:$0x3]  ;;  %vm1538_vm1 = vcmask 7168   ;;  %p2678_p9 = scmp.ne.s32.totalorder %s3121_s29, 1 }
  0x96   : > { %1297 = vmatpush.bf16.msrb.mxu2 %v2557_v20  ;;  %v3669_v6 = vperm.slane %v3666_v5, 0  ;;  %s1575_s11 = sld [smem:[#allocation3]] (!%p2678_p9)  ;;  %s2679_s29 = sshll.u32 (!%p2678_p9), %s3125_s30, 7 }
  0x97   : > { %1014 = vmatmul.bf16.gmra.mxu0 %v3517_v50  ;;  %1346 = vmatpush.bf16.msrb.mxu3 %v2621_v29  ;;  %s3144_s30 = smov (!%p2678_p9), 1  }
  0x98   : > { %1063 = vmatmul.bf16.gmra.mxu1 %v3519_v51 }
  0x99   : > { %1112 = vmatmul.bf16.gmra.mxu2 %v3521_v52 }
  0x9a   : > { %1161 = vmatmul.bf16.gmra.mxu3 %v3523_v53 }
  0xa7   : > { %1019 = vmatmul.bf16.gmra.mxu0 %v3545_v13 }
  0xa8   : > { %1068 = vmatmul.bf16.gmra.mxu1 %v3547_v14 }
  0xa9   : > { %1117 = vmatmul.bf16.gmra.mxu2 %v3549_v15 }
  0xaa   : > { %1166 = vmatmul.bf16.gmra.mxu3 %v3551_v16 }
  0xb7   : > { %1024 = vmatmul.bf16.gmra.mxu0 %v3573_v41 }
  0xb8   : > { %1073 = vmatmul.bf16.gmra.mxu1 %v3575_v42 }
  0xb9   : > { %1122 = vmatmul.bf16.gmra.mxu2 %v3577_v43 }
  0xba   : > { %1171 = vmatmul.bf16.gmra.mxu3 %v3579_v44 }
  0xc7   : > { %1029 = vmatmul.bf16.gmra.mxu0 %v3601_v9 }
  0xc8   : > { %1078 = vmatmul.bf16.gmra.mxu1 %v3603_v10 }
  0xc9   : > { %1127 = vmatmul.bf16.gmra.mxu2 %v3605_v11 }
  0xca   : > { %1176 = vmatmul.bf16.gmra.mxu3 %v3607_v12 }
  0xd7   : > { %1034 = vmatmul.bf16.gmra.mxu0 %v3629_v45 }
  0xd8   : > { %1083 = vmatmul.bf16.gmra.mxu1 %v3631_v46 }
  0xd9   : > { %1132 = vmatmul.bf16.gmra.mxu2 %v3633_v47 }
  0xda   : > { %1181 = vmatmul.bf16.gmra.mxu3 %v3635_v48 }
  0xe7   : > { %1039 = vmatmul.bf16.gmra.mxu0 %v3649_v1 }
  0xe8   : > { %1088 = vmatmul.bf16.gmra.mxu1 %v3651_v2 }
  0xe9   : > { %1137 = vmatmul.bf16.gmra.mxu2 %v3653_v3 }
  0xea   : > { %1186 = vmatmul.bf16.gmra.mxu3 %v3655_v4 }
  0xf4   : > { %v1005_v7 = vpop.f32.mrf.mxu0 }
  0xf5   : > { %v1006_v8 = vadd.f32 %v1005_v7, %v3669_v6  ;;  %v1054_v17 = vpop.f32.mrf.mxu1 }
  0xf7   : > { %v1055_v18 = vadd.f32 %v1054_v17, %v1006_v8  ;;  %1200 = vmatmul.bf16.vlgmr.msrb.gmra.mxu0 %v3452_v49 }
  0xf8   : > { %1249 = vmatmul.bf16.vlgmr.msrb.gmra.mxu1 %v3457_v54 }
  0xf9   : > { %1298 = vmatmul.bf16.vlgmr.msrb.gmra.mxu2 %v3459_v55 }
  0xfa   : > { %1347 = vmatmul.bf16.vlgmr.msrb.gmra.mxu3 %v3463_v58 }
  0xfc   : > { %v1103_v19 = vpop.f32.mrf.mxu2  ;;  %v1007_v22 = vpop.f32.mrf.mxu0 }
  0xfd   : > { %v1104_v20 = vadd.f32 %v1103_v19, %v1055_v18  ;;  %v1152_v21 = vpop.f32.mrf.mxu3  ;;  %v1008_v23 = vadd.f32 %v1007_v22, %v3669_v6  ;;  %v1056_v24 = vpop.f32.mrf.mxu1 }
  0xff   : > { %v3677_v29 = vadd.f32 %v1152_v21, %v1104_v20  ;;  %v1057_v30 = vadd.f32 %v1056_v24, %v1008_v23 }
 0x104   : > { %v1105_v31 = vpop.f32.mrf.mxu2  ;;  %v1010_v49 = vpop.f32.mrf.mxu0 }
 0x105   : > { %v1106_v32 = vadd.f32 %v1105_v31, %v1057_v30  ;;  %v1154_v33 = vpop.f32.mrf.mxu3  ;;  %v1011_v54 = vadd.f32 %v1010_v49, %v3669_v6  ;;  %v1059_v34 = vpop.f32.mrf.mxu1 }
 0x107   : > { %v3680_v55 = vadd.f32 %v1154_v33, %v1106_v32  ;;  %v1060_v58 = vadd.f32 %v1059_v34, %v1011_v54  ;;  %1205 = vmatmul.bf16.gmra.mxu0 %v3489_v25 }
 0x108   : > { %1254 = vmatmul.bf16.gmra.mxu1 %v3491_v26 }
 0x109   : > { %1303 = vmatmul.bf16.gmra.mxu2 %v3493_v27 }
 0x10a   : > { %1352 = vmatmul.bf16.gmra.mxu3 %v3495_v28 }
 0x10c   : > { %v1108_v35 = vpop.f32.mrf.mxu2  ;;  %v1012_v38 = vpop.f32.mrf.mxu0 }
 0x10d   : > { %v1109_v36 = vadd.f32 %v1108_v35, %v1060_v58  ;;  %v1157_v37 = vpop.f32.mrf.mxu3  ;;  %v1013_v39 = vadd.f32 %v1012_v38, %v3669_v6  ;;  %v1061_v40 = vpop.f32.mrf.mxu1 }
 0x10f   : > { %v3687_v56 = vadd.f32 %v1157_v37, %v1109_v36  ;;  %v1062_v57 = vadd.f32 %v1061_v40, %v1013_v39 }
 0x114   : > { %v1110_v59 = vpop.f32.mrf.mxu2  ;;  %v1015_v25 = vpop.f32.mrf.mxu0 }
 0x115   : > { %v1111_v60 = vadd.f32 %v1110_v59, %v1062_v57  ;;  %v1159_v61 = vpop.f32.mrf.mxu3  ;;  %v1016_v26 = vadd.f32 %v1015_v25, %v3669_v6  ;;  %v1064_v62 = vpop.f32.mrf.mxu1 }
 0x117   : > { %v3690_v27 = vadd.f32 %v1159_v61, %v1111_v60  ;;  %v1065_v28 = vadd.f32 %v1064_v62, %v1016_v26  ;;  %1210 = vmatmul.bf16.gmra.mxu0 %v3517_v50 }
 0x118   : > { %1259 = vmatmul.bf16.gmra.mxu1 %v3519_v51 }
 0x119   : > { %1308 = vmatmul.bf16.gmra.mxu2 %v3521_v52 }
 0x11a   : > { %1357 = vmatmul.bf16.gmra.mxu3 %v3523_v53 }
 0x11c   : > { %v1113_v63 = vpop.f32.mrf.mxu2  ;;  %v1017_v8 = vpop.f32.mrf.mxu0 }
 0x11d   : > { %v1114_v0 = vadd.f32 %v1113_v63, %v1065_v28  ;;  %v1162_v7 = vpop.f32.mrf.mxu3  ;;  %v1018_v17 = vadd.f32 %v1017_v8, %v3669_v6  ;;  %v1066_v18 = vpop.f32.mrf.mxu1 }
 0x11f   : > { %v3697_v19 = vadd.f32 %v1162_v7, %v1114_v0  ;;  %v1067_v20 = vadd.f32 %v1066_v18, %v1018_v17 }
 0x124   : > { %v1115_v21 = vpop.f32.mrf.mxu2  ;;  %v1020_v50 = vpop.f32.mrf.mxu0 }
 0x125   : > { %v1116_v22 = vadd.f32 %v1115_v21, %v1067_v20  ;;  %v1164_v23 = vpop.f32.mrf.mxu3  ;;  %v1021_v51 = vadd.f32 %v1020_v50, %v3669_v6  ;;  %v1069_v24 = vpop.f32.mrf.mxu1 }
 0x127   : > { %v3700_v52 = vadd.f32 %v1164_v23, %v1116_v22  ;;  %v1070_v53 = vadd.f32 %v1069_v24, %v1021_v51  ;;  %1215 = vmatmul.bf16.gmra.mxu0 %v3545_v13 }
 0x128   : > { %1264 = vmatmul.bf16.gmra.mxu1 %v3547_v14 }
 0x129   : > { %1313 = vmatmul.bf16.gmra.mxu2 %v3549_v15 }
 0x12a   : > { %1362 = vmatmul.bf16.gmra.mxu3 %v3551_v16 }
 0x12c   : > { %v1118_v30 = vpop.f32.mrf.mxu2  ;;  %v1022_v33 = vpop.f32.mrf.mxu0 }
 0x12d   : > { %v1119_v31 = vadd.f32 %v1118_v30, %v1070_v53  ;;  %v1167_v32 = vpop.f32.mrf.mxu3  ;;  %v1023_v49 = vadd.f32 %v1022_v33, %v3669_v6  ;;  %v1071_v54 = vpop.f32.mrf.mxu1 }
 0x12f   : > { %v3707_v34 = vadd.f32 %v1167_v32, %v1119_v31  ;;  %v1072_v58 = vadd.f32 %v1071_v54, %v1023_v49 }
 0x134   : > { %v1120_v35 = vpop.f32.mrf.mxu2  ;;  %v1025_v13 = vpop.f32.mrf.mxu0 }
 0x135   : > { %v1121_v36 = vadd.f32 %v1120_v35, %v1072_v58  ;;  %v1169_v37 = vpop.f32.mrf.mxu3  ;;  %v1026_v14 = vadd.f32 %v1025_v13, %v3669_v6  ;;  %v1074_v38 = vpop.f32.mrf.mxu1 }
 0x137   : > { %v3710_v15 = vadd.f32 %v1169_v37, %v1121_v36  ;;  %v1075_v16 = vadd.f32 %v1074_v38, %v1026_v14  ;;  %1220 = vmatmul.bf16.gmra.mxu0 %v3573_v41 }
 0x138   : > { %1269 = vmatmul.bf16.gmra.mxu1 %v3575_v42 }
 0x139   : > { %1318 = vmatmul.bf16.gmra.mxu2 %v3577_v43 }
 0x13a   : > { %1367 = vmatmul.bf16.gmra.mxu3 %v3579_v44 }
 0x13c   : > { %v1123_v39 = vpop.f32.mrf.mxu2  ;;  %v1027_v59 = vpop.f32.mrf.mxu0 }
 0x13d   : > { %v1124_v40 = vadd.f32 %v1123_v39, %v1075_v16  ;;  %v1172_v57 = vpop.f32.mrf.mxu3  ;;  %v1028_v60 = vadd.f32 %v1027_v59, %v3669_v6  ;;  %v1076_v61 = vpop.f32.mrf.mxu1 }
 0x13f   : > { %v3717_v25 = vadd.f32 %v1172_v57, %v1124_v40  ;;  %v1077_v26 = vadd.f32 %v1076_v61, %v1028_v60 }
 0x144   : > { %v1125_v62 = vpop.f32.mrf.mxu2  ;;  %v1030_v41 = vpop.f32.mrf.mxu0 }
 0x145   : > { %v1126_v28 = vadd.f32 %v1125_v62, %v1077_v26  ;;  %v1174_v63 = vpop.f32.mrf.mxu3  ;;  %v1031_v42 = vadd.f32 %v1030_v41, %v3669_v6  ;;  %v1079_v0 = vpop.f32.mrf.mxu1  ;;  %v3750_v26 = vperm.slane %v3666_v5, 1 }
 0x147   : > { %v3720_v43 = vadd.f32 %v1174_v63, %v1126_v28  ;;  %v1080_v44 = vadd.f32 %v1079_v0, %v1031_v42  ;;  %1225 = vmatmul.bf16.gmra.mxu0 %v3601_v9 }
 0x148   : > { %1274 = vmatmul.bf16.gmra.mxu1 %v3603_v10 }
 0x149   : > { %1323 = vmatmul.bf16.gmra.mxu2 %v3605_v11 }
 0x14a   : > { %1372 = vmatmul.bf16.gmra.mxu3 %v3607_v12 }
 0x14c   : > { %v1128_v7 = vpop.f32.mrf.mxu2  ;;  %v1032_v18 = vpop.f32.mrf.mxu0 }
 0x14d   : > { %v1129_v8 = vadd.f32 %v1128_v7, %v1080_v44  ;;  %v1177_v17 = vpop.f32.mrf.mxu3  ;;  %v1033_v20 = vadd.f32 %v1032_v18, %v3669_v6  ;;  %v1081_v21 = vpop.f32.mrf.mxu1 }
 0x14f   : > { %v3727_v22 = vadd.f32 %v1177_v17, %v1129_v8  ;;  %v1082_v23 = vadd.f32 %v1081_v21, %v1033_v20  ;;  %v1388_v17 = vmax.f32 %v3677_v29, 0.0  ;;  %v1390_v29 = vmax.f32 %v3680_v55, 0.0 }
 0x154   : > { %v1130_v50 = vpop.f32.mrf.mxu2  ;;  %v1035_v9 = vpop.f32.mrf.mxu0 }
 0x155   : > { %v1131_v51 = vadd.f32 %v1130_v50, %v1082_v23  ;;  %v1179_v24 = vpop.f32.mrf.mxu3  ;;  %v1036_v10 = vadd.f32 %v1035_v9, %v3669_v6  ;;  %v1084_v53 = vpop.f32.mrf.mxu1 }
 0x157   : > { %v3730_v11 = vadd.f32 %v1179_v24, %v1131_v51  ;;  %v1085_v12 = vadd.f32 %v1084_v53, %v1036_v10  ;;  %1230 = vmatmul.bf16.gmra.mxu0 %v3629_v45 }
 0x158   : > { %1279 = vmatmul.bf16.gmra.mxu1 %v3631_v46 }
 0x159   : > { %1328 = vmatmul.bf16.gmra.mxu2 %v3633_v47 }
 0x15a   : > { %1377 = vmatmul.bf16.gmra.mxu3 %v3635_v48 }
 0x15c   : > { %v1133_v30 = vpop.f32.mrf.mxu2  ;;  %v1037_v33 = vpop.f32.mrf.mxu0 }
 0x15d   : > { %v1134_v31 = vadd.f32 %v1133_v30, %v1085_v12  ;;  %v1182_v32 = vpop.f32.mrf.mxu3  ;;  %v1038_v49 = vadd.f32 %v1037_v33, %v3669_v6  ;;  %v1086_v54 = vpop.f32.mrf.mxu1 }
 0x15f   : > { %v3737_v58 = vadd.f32 %v1182_v32, %v1134_v31  ;;  %v1087_v35 = vadd.f32 %v1086_v54, %v1038_v49 }
 0x164   : > { %v1135_v36 = vpop.f32.mrf.mxu2  ;;  %v1040_v45 = vpop.f32.mrf.mxu0 }
 0x165   : > { %v1136_v37 = vadd.f32 %v1135_v36, %v1087_v35  ;;  %v1184_v13 = vpop.f32.mrf.mxu3  ;;  %v1041_v46 = vadd.f32 %v1040_v45, %v3669_v6  ;;  %v1089_v14 = vpop.f32.mrf.mxu1 }
 0x167   : > { %v3740_v47 = vadd.f32 %v1184_v13, %v1136_v37  ;;  %v1090_v48 = vadd.f32 %v1089_v14, %v1041_v46  ;;  %1235 = vmatmul.bf16.gmra.mxu0 %v3649_v1 }
 0x168   : > { %1284 = vmatmul.bf16.gmra.mxu1 %v3651_v2 }
 0x169   : > { %1333 = vmatmul.bf16.gmra.mxu2 %v3653_v3 }
 0x16a   : > { %1382 = vmatmul.bf16.gmra.mxu3 %v3655_v4 }
 0x16c   : > { %v1138_v38 = vpop.f32.mrf.mxu2  ;;  %v1042_v40 = vpop.f32.mrf.mxu0 }
 0x16d   : > { %v1139_v16 = vadd.f32 %v1138_v38, %v1090_v48  ;;  %v1187_v39 = vpop.f32.mrf.mxu3  ;;  %v1043_v57 = vadd.f32 %v1042_v40, %v3669_v6  ;;  %v1091_v59 = vpop.f32.mrf.mxu1  ;;  %v1436_v6 = vld [vmem:[%s385_s26] sm:$0x3]  ;;  %v1392_v38 = vmax.f32 %v3687_v56, 0.0  ;;  %v1394_v56 = vmax.f32 %v3690_v27, 0.0 }
 0x16e   : > { %v3760_v7 = vperm.slane %v1436_v6, 0  ;;  %v3764_v21 = vperm.slane %v1436_v6, 1 }
 0x16f   : > { %v3747_v60 = vadd.f32 %v1187_v39, %v1139_v16  ;;  %v1092_v61 = vadd.f32 %v1091_v59, %v1043_v57 }
 0x170   : > { %v1442_v51 = vmul.f32 %v3760_v7, %v1388_v17  ;;  %v1444_v36 = vmul.f32 %v3760_v7, %v1390_v29  ;;  %v1446_v57 = vmul.f32 %v3760_v7, %v1392_v38 }
 0x174   : > { %v1140_v1 = vpop.f32.mrf.mxu2  ;;  %v1201_v3 = vpop.f32.mrf.mxu0 }
 0x175   : > { %v1141_v2 = vadd.f32 %v1140_v1, %v1092_v61  ;;  %v1189_v62 = vpop.f32.mrf.mxu3  ;;  %v1202_v4 = vadd.f32 %v1201_v3, %v3750_v26  ;;  %v1250_v28 = vpop.f32.mrf.mxu1 }
 0x177   : > { %v3753_v63 = vadd.f32 %v1189_v62, %v1141_v2  ;;  %v1251_v41 = vadd.f32 %v1250_v28, %v1202_v4 }
 0x17c   : > { %v1299_v42 = vpop.f32.mrf.mxu2  ;;  %v1203_v5 = vpop.f32.mrf.mxu0 }
 0x17d   : > { %v1300_v0 = vadd.f32 %v1299_v42, %v1251_v41  ;;  %v1348_v44 = vpop.f32.mrf.mxu3  ;;  %v1252_v8 = vpop.f32.mrf.mxu1  ;;  %v1204_v20 = vadd.f32 %v1203_v5, %v3750_v26 }
 0x17f   : > { %v1349_v18 = vadd.f32 %v1348_v44, %v1300_v0  ;;  %v1253_v50 = vadd.f32 %v1252_v8, %v1204_v20  ;;  %v1448_v44 = vmul.f32 %v3760_v7, %v1394_v56 }
 0x181   : > { %v1389_v23 = vmax.f32 %v1349_v18, 0.0 }
 0x183   : > { %v1443_v24 = vmul.f32 %v3764_v21, %v1389_v23 }
 0x184   : > { %v1301_v9 = vpop.f32.mrf.mxu2  ;;  %v1206_v12 = vpop.f32.mrf.mxu0 }
 0x185   : > { %v1302_v10 = vadd.f32 %v1301_v9, %v1253_v50  ;;  %v1350_v53 = vpop.f32.mrf.mxu3  ;;  %v1474_v30 = vadd.f32 %v1443_v24, %v1442_v51  ;;  %v1207_v31 = vadd.f32 %v1206_v12, %v3750_v26  ;;  %v1255_v32 = vpop.f32.mrf.mxu1  ;;  %v1396_v50 = vmax.f32 %v3697_v19, 0.0 }
 0x186   : > { %v1398_v19 = vmax.f32 %v3700_v52, 0.0 }
 0x187   : > { %v1351_v33 = vadd.f32 %v1350_v53, %v1302_v10  ;;  %1475 = vadd.xlane.f32.xlu0 %v1474_v30  ;;  %v1256_v54 = vadd.f32 %v1255_v32, %v1207_v31  ;;  %v1450_v10 = vmul.f32 %v3760_v7, %v1396_v50  ;;  %v1404_v50 = vmax.f32 %v3717_v25, 0.0 }
 0x188   : > { %v1406_v25 = vmax.f32 %v3720_v43, 0.0 }
 0x189   : > { %v1391_v49 = vmax.f32 %v1351_v33, 0.0 }
 0x18b   : > { %v1445_v35 = vmul.f32 %v3764_v21, %v1391_v49 }
 0x18c   : > { %v1304_v37 = vpop.f32.mrf.mxu2  ;;  %v1208_v46 = vpop.f32.mrf.mxu0 }
 0x18d   : > { %v1305_v13 = vadd.f32 %v1304_v37, %v1256_v54  ;;  %v1353_v45 = vpop.f32.mrf.mxu3  ;;  %v1477_v14 = vadd.f32 %v1445_v35, %v1444_v36  ;;  %v1257_v48 = vpop.f32.mrf.mxu1  ;;  %v1209_v39 = vadd.f32 %v1208_v46, %v3750_v26 }
 0x18f   : > { %v1354_v16 = vadd.f32 %v1353_v45, %v1305_v13  ;;  %1478 = vadd.xlane.f32.xlu0 %v1477_v14  ;;  %v1258_v40 = vadd.f32 %v1257_v48, %v1209_v39  ;;  %v1452_v13 = vmul.f32 %v3760_v7, %v1398_v19  ;;  %v1400_v39 = vmax.f32 %v3707_v34, 0.0 }
 0x190   : > { %v1402_v34 = vmax.f32 %v3710_v15, 0.0 }
 0x191   : > { %v1393_v55 = vmax.f32 %v1354_v16, 0.0 }
 0x193   : > { %v1447_v59 = vmul.f32 %v3764_v21, %v1393_v55 }
 0x194   : > { %v1306_v61 = vpop.f32.mrf.mxu2  ;;  %v1211_v62 = vpop.f32.mrf.mxu0 }
 0x195   : > { %v1307_v1 = vadd.f32 %v1306_v61, %v1258_v40  ;;  %v1355_v2 = vpop.f32.mrf.mxu3  ;;  %v1480_v3 = vadd.f32 %v1447_v59, %v1446_v57  ;;  %v1212_v4 = vadd.f32 %v1211_v62, %v3750_v26  ;;  %v1260_v28 = vpop.f32.mrf.mxu1  ;;  %v1454_v57 = vmul.f32 %v3760_v7, %v1400_v39 }
 0x197   : > { %v1356_v41 = vadd.f32 %v1355_v2, %v1307_v1  ;;  %1481 = vadd.xlane.f32.xlu1 %v1480_v3  ;;  %v1261_v42 = vadd.f32 %v1260_v28, %v1212_v4 }
 0x199   : > { %v1395_v6 = vmax.f32 %v1356_v41, 0.0 }
 0x19b   : > { %v1449_v0 = vmul.f32 %v3764_v21, %v1395_v6 }
 0x19c   : > { %v1309_v5 = vpop.f32.mrf.mxu2  ;;  %v1213_v18 = vpop.f32.mrf.mxu0 }
 0x19d   : > { %v1310_v8 = vadd.f32 %v1309_v5, %v1261_v42  ;;  %v1358_v17 = vpop.f32.mrf.mxu3  ;;  %v1483_v20 = vadd.f32 %v1449_v0, %v1448_v44  ;;  %v1262_v23 = vpop.f32.mrf.mxu1  ;;  %v1214_v24 = vadd.f32 %v1213_v18, %v3750_v26  ;;  %v1456_v44 = vmul.f32 %v3760_v7, %v1402_v34 }
 0x19f   : > { %v1359_v51 = vadd.f32 %v1358_v17, %v1310_v8  ;;  %1484 = vadd.xlane.f32.xlu1 %v1483_v20  ;;  %v1263_v9 = vadd.f32 %v1262_v23, %v1214_v24 }
 0x1a1   : > { %v1397_v27 = vmax.f32 %v1359_v51, 0.0 }
 0x1a3   : > { %v1451_v53 = vmul.f32 %v3764_v21, %v1397_v27  ;;  %v1458_v27 = vmul.f32 %v3760_v7, %v1404_v50 }
 0x1a4   : > { %v1311_v12 = vpop.f32.mrf.mxu2  ;;  %v1216_v32 = vpop.f32.mrf.mxu0 }
 0x1a5   : > { %v1312_v30 = vadd.f32 %v1311_v12, %v1263_v9  ;;  %v1360_v31 = vpop.f32.mrf.mxu3  ;;  %v1486_v29 = vadd.f32 %v1451_v53, %v1450_v10  ;;  %v1217_v33 = vadd.f32 %v1216_v32, %v3750_v26  ;;  %v1265_v49 = vpop.f32.mrf.mxu1 }
 0x1a7   : > { %v1361_v54 = vadd.f32 %v1360_v31, %v1312_v30  ;;  %1487 = vadd.xlane.f32.xlu2 %v1486_v29  ;;  %v1266_v36 = vadd.f32 %v1265_v49, %v1217_v33 }
 0x1a9   : > { %v1399_v35 = vmax.f32 %v1361_v54, 0.0 }
 0x1ab   : > { %v1453_v37 = vmul.f32 %v3764_v21, %v1399_v35  ;;  %v1460_v35 = vmul.f32 %v3760_v7, %v1406_v25 }
 0x1ac   : > { %v1314_v45 = vpop.f32.mrf.mxu2  ;;  %v1218_v48 = vpop.f32.mrf.mxu0 }
 0x1ad   : > { %v1315_v46 = vadd.f32 %v1314_v45, %v1266_v36  ;;  %v1363_v14 = vpop.f32.mrf.mxu3  ;;  %v1489_v38 = vadd.f32 %v1453_v37, %v1452_v13  ;;  %v1267_v16 = vpop.f32.mrf.mxu1  ;;  %v1219_v40 = vadd.f32 %v1218_v48, %v3750_v26 }
 0x1af   : > { %v1364_v55 = vadd.f32 %v1363_v14, %v1315_v46  ;;  %1490 = vadd.xlane.f32.xlu2 %v1489_v38  ;;  %v1268_v61 = vadd.f32 %v1267_v16, %v1219_v40  ;;  %v1408_v38 = vmax.f32 %v3727_v22, 0.0  ;;  %v1410_v22 = vmax.f32 %v3730_v11, 0.0 }
 0x1b1   : > { %v1401_v52 = vmax.f32 %v1364_v55, 0.0  ;;  %v1462_v55 = vmul.f32 %v3760_v7, %v1408_v38  ;;  %v1464_v34 = vmul.f32 %v3760_v7, %v1410_v22 }
 0x1b3   : > { %v1455_v59 = vmul.f32 %v3764_v21, %v1401_v52 }
 0x1b4   : > { %v1316_v1 = vpop.f32.mrf.mxu2  ;;  %v1221_v3 = vpop.f32.mrf.mxu0 }
 0x1b5   : > { %v1317_v2 = vadd.f32 %v1316_v1, %v1268_v61  ;;  %v1365_v62 = vpop.f32.mrf.mxu3  ;;  %v1492_v4 = vadd.f32 %v1455_v59, %v1454_v57  ;;  %v1222_v28 = vadd.f32 %v1221_v3, %v3750_v26  ;;  %v1270_v56 = vpop.f32.mrf.mxu1 }
 0x1b7   : > { %v1366_v41 = vadd.f32 %v1365_v62, %v1317_v2  ;;  %1493 = vadd.xlane.f32.xlu0 %v1492_v4  ;;  %v1271_v42 = vadd.f32 %v1270_v56, %v1222_v28 }
 0x1b9   : > { %v1403_v6 = vmax.f32 %v1366_v41, 0.0 }
 0x1bb   : > { %v1457_v0 = vmul.f32 %v3764_v21, %v1403_v6 }
 0x1bc   : > { %v1319_v5 = vpop.f32.mrf.mxu2  ;;  %v1223_v18 = vpop.f32.mrf.mxu0 }
 0x1bd   : > { %v1320_v8 = vadd.f32 %v1319_v5, %v1271_v42  ;;  %v1368_v17 = vpop.f32.mrf.mxu3  ;;  %v1495_v20 = vadd.f32 %v1457_v0, %v1456_v44  ;;  %v1272_v23 = vpop.f32.mrf.mxu1  ;;  %v1224_v24 = vadd.f32 %v1223_v18, %v3750_v26 }
 0x1bf   : > { %v1369_v51 = vadd.f32 %v1368_v17, %v1320_v8  ;;  %1496 = vadd.xlane.f32.xlu1 %v1495_v20  ;;  %v1273_v10 = vadd.f32 %v1272_v23, %v1224_v24  ;;  %v1412_v17 = vmax.f32 %v3737_v58, 0.0 }
 0x1c1   : > { %v1405_v15 = vmax.f32 %v1369_v51, 0.0  ;;  %v1466_v23 = vmul.f32 %v3760_v7, %v1412_v17  ;;  %v1427_v17 = vld [vmem:[#allocation2 + $0x38] sm:$0xff] }
 0x1c3   : > { %v1459_v9 = vmul.f32 %v3764_v21, %v1405_v15 }
 0x1c4   : > { %v1321_v53 = vpop.f32.mrf.mxu2  ;;  %v1226_v31 = vpop.f32.mrf.mxu0 }
 0x1c5   : > { %v1322_v12 = vadd.f32 %v1321_v53, %v1273_v10  ;;  %v1370_v30 = vpop.f32.mrf.mxu3  ;;  %v1498_v32 = vadd.f32 %v1459_v9, %v1458_v27  ;;  %v1227_v29 = vadd.f32 %v1226_v31, %v3750_v26  ;;  %v1275_v33 = vpop.f32.mrf.mxu1 }
 0x1c7   : > { %v1371_v49 = vadd.f32 %v1370_v30, %v1322_v12  ;;  %1499 = vadd.xlane.f32.xlu2 %v1498_v32  ;;  %v1276_v54 = vadd.f32 %v1275_v33, %v1227_v29  ;;  %v1414_v12 = vmax.f32 %v3740_v47, 0.0 }
 0x1c9   : > { %v1407_v19 = vmax.f32 %v1371_v49, 0.0  ;;  %v1468_v29 = vmul.f32 %v3760_v7, %v1414_v12 }
 0x1cb   : > { %v1461_v36 = vmul.f32 %v3764_v21, %v1407_v19 }
 0x1cc   : > { %v1324_v37 = vpop.f32.mrf.mxu2  ;;  %v1228_v46 = vpop.f32.mrf.mxu0 }
 0x1cd   : > { %v1325_v13 = vadd.f32 %v1324_v37, %v1276_v54  ;;  %v1373_v45 = vpop.f32.mrf.mxu3  ;;  %v1501_v14 = vadd.f32 %v1461_v36, %v1460_v35  ;;  %v1277_v48 = vpop.f32.mrf.mxu1  ;;  %v1229_v39 = vadd.f32 %v1228_v46, %v3750_v26  ;;  %v1416_v36 = vmax.f32 %v3747_v60, 0.0  ;;  %v1420_v60 = vld [vmem:[#allocation2] sm:$0xff] }
 0x1cf   : > { %v1374_v16 = vadd.f32 %v1373_v45, %v1325_v13  ;;  %1502 = vadd.xlane.f32.xlu0 %v1501_v14  ;;  %v1278_v52 = vadd.f32 %v1277_v48, %v1229_v39  ;;  %v1470_v46 = vmul.f32 %v3760_v7, %v1416_v36 }
 0x1d1   : > { %v1409_v43 = vmax.f32 %v1374_v16, 0.0 }
 0x1d3   : > { %v1463_v40 = vmul.f32 %v3764_v21, %v1409_v43 }
 0x1d4   : > { %v1326_v57 = vpop.f32.mrf.mxu2  ;;  %v1231_v1 = vpop.f32.mrf.mxu0 }
 0x1d5   : > { %v1327_v59 = vadd.f32 %v1326_v57, %v1278_v52  ;;  %v1375_v61 = vpop.f32.mrf.mxu3  ;;  %v1504_v2 = vadd.f32 %v1463_v40, %v1462_v55  ;;  %v1232_v62 = vadd.f32 %v1231_v1, %v3750_v26  ;;  %v1280_v3 = vpop.f32.mrf.mxu1  ;;  %v1418_v55 = vmax.f32 %v3753_v63, 0.0  ;;  %v1422_v63 = vld [vmem:[#allocation2 + $0x10] sm:$0xff] }
 0x1d7   : > { %v1376_v4 = vadd.f32 %v1375_v61, %v1327_v59  ;;  %1505 = vadd.xlane.f32.xlu1 %v1504_v2  ;;  %v1281_v56 = vadd.f32 %v1280_v3, %v1232_v62  ;;  %v1472_v57 = vmul.f32 %v3760_v7, %v1418_v55  ;;  %v1421_v2 = vld [vmem:[#allocation2 + $0x8] sm:$0xff] }
 0x1d9   : > { %v1411_v28 = vmax.f32 %v1376_v4, 0.0 }
 0x1db   : > { %v1465_v41 = vmul.f32 %v3764_v21, %v1411_v28  ;;  %v1423_v28 = vld [vmem:[#allocation2 + $0x18] sm:$0xff] }
 0x1dc   : > { %v1329_v6 = vpop.f32.mrf.mxu2  ;;  %v1233_v44 = vpop.f32.mrf.mxu0 }
 0x1dd   : > { %v1330_v42 = vadd.f32 %v1329_v6, %v1281_v56  ;;  %v1378_v0 = vpop.f32.mrf.mxu3  ;;  %v1507_v5 = vadd.f32 %v1465_v41, %v1464_v34  ;;  %v1282_v8 = vpop.f32.mrf.mxu1  ;;  %v1234_v20 = vadd.f32 %v1233_v44, %v3750_v26  ;;  %v1425_v6 = vld [vmem:[#allocation2 + $0x28] sm:$0xff]  ;;  %v1426_v44 = vld [vmem:[#allocation2 + $0x30] sm:$0xff] }
 0x1df   : > { %v1379_v18 = vadd.f32 %v1378_v0, %v1330_v42  ;;  %1508 = vadd.xlane.f32.xlu2 %v1507_v5  ;;  %v1283_v51 = vadd.f32 %v1282_v8, %v1234_v20 }
 0x1e1   : > { %v1413_v11 = vmax.f32 %v1379_v18, 0.0 }
 0x1e3   : > { %v1467_v50 = vmul.f32 %v3764_v21, %v1413_v11  ;;  %v1428_v11 = vld [vmem:[#allocation2 + $0x40] sm:$0xff] }
 0x1e4   : > { %v1331_v24 = vpop.f32.mrf.mxu2  ;;  %v1236_v9 = vpop.f32.mrf.mxu0 }
 0x1e5   : > { %v1332_v15 = vadd.f32 %v1331_v24, %v1283_v51  ;;  %v1380_v27 = vpop.f32.mrf.mxu3  ;;  %v1510_v10 = vadd.f32 %v1467_v50, %v1466_v23  ;;  %v1237_v53 = vadd.f32 %v1236_v9, %v3750_v26  ;;  %v1285_v30 = vpop.f32.mrf.mxu1  ;;  %v1429_v51 = vld [vmem:[#allocation2 + $0x48] sm:$0xff] }
 0x1e7   : > { %v1381_v58 = vadd.f32 %v1380_v27, %v1332_v15  ;;  %1511 = vadd.xlane.f32.xlu0 %v1510_v10  ;;  %v1286_v32 = vadd.f32 %v1285_v30, %v1237_v53  ;;  %v1430_v27 = vld [vmem:[#allocation2 + $0x50] sm:$0xff]  ;;  %v1431_v53 = vld [vmem:[#allocation2 + $0x58] sm:$0xff]  ;;  %v1432_v30 = vld [vmem:[#allocation2 + $0x60] sm:$0xff] }
 0x1e9   : > { %v1415_v31 = vmax.f32 %v1381_v58, 0.0 }
 0x1eb   : > { %v1469_v33 = vmul.f32 %v3764_v21, %v1415_v31 }
 0x1ec   : > { %v1334_v25 = vpop.f32.mrf.mxu2  ;;  %v1238_v54 = vpop.f32.mrf.mxu0 }
 0x1ed   : > { %v1335_v49 = vadd.f32 %v1334_v25, %v1286_v32  ;;  %v1383_v19 = vpop.f32.mrf.mxu3  ;;  %v1513_v35 = vadd.f32 %v1469_v33, %v1468_v29  ;;  %v1239_v13 = vadd.f32 %v1238_v54, %v3750_v26  ;;  %v1287_v45 = vpop.f32.mrf.mxu1  ;;  %v1433_v29 = vld [vmem:[#allocation2 + $0x68] sm:$0xff] }
 0x1ef   : > { %v1384_v37 = vadd.f32 %v1383_v19, %v1335_v49  ;;  %1514 = vadd.xlane.f32.xlu1 %v1513_v35  ;;  %v1288_v48 = vadd.f32 %v1287_v45, %v1239_v13  ;;  %v1434_v49 = vld [vmem:[#allocation2 + $0x70] sm:$0xff]  ;;  %v1435_v35 = vld [vmem:[#allocation2 + $0x78] sm:$0xff] }
 0x1f1   : > { %v1417_v47 = vmax.f32 %v1384_v37, 0.0 }
 0x1f3   : > { %v1471_v14 = vmul.f32 %v3764_v21, %v1417_v47 }
 0x1f4   : > { %v1336_v38 = vpop.f32.mrf.mxu2 }
 0x1f5   : > { %v1337_v16 = vadd.f32 %v1336_v38, %v1288_v48  ;;  %v1516_v39 = vadd.f32 %v1471_v14, %v1470_v46  ;;  %v1385_v43 = vpop.f32.mrf.mxu3 }
 0x1f7   : > { %v1386_v40 = vadd.f32 %v1385_v43, %v1337_v16  ;;  %1517 = vadd.xlane.f32.xlu2 %v1516_v39 }
 0x1f9   : > { %v1419_v52 = vmax.f32 %v1386_v40, 0.0 }
 0x1fa   : > { %v1476_v26 = vpop.xlane.xlu0 %1475 }
 0x1fb   : > { %v1473_v59 = vmul.f32 %v3764_v21, %v1419_v52  ;;  %v1522_v61 = vadd.f32 %v1476_v26, %v1420_v60  ;;  %v1424_v21 = vld [vmem:[#allocation2 + $0x20] sm:$0xff] }
 0x1fd   : > { %1539 = vst.msk [vmem:[#allocation2] sm:$0xff] %vm1538_vm1, %v1522_v61  ;;  %v1519_v1 = vadd.f32 %v1473_v59, %v1472_v57 }
 0x1ff   : > { %1520 = vadd.xlane.f32.xlu0 %v1519_v1 }
 0x202   : > { %v1479_v62 = vpop.xlane.xlu0 %1478 }
 0x203   : > { %v1523_v3 = vadd.f32 %v1479_v62, %v1421_v2 }
 0x205   : > { %1540 = vst.msk [vmem:[#allocation2 + $0x8] sm:$0xff] %vm1538_vm1, %v1523_v3 }
 0x20a   : > { %v1482_v22 = vpop.xlane.xlu1 %1481 }
 0x20b   : > { %v1524_v4 = vadd.f32 %v1482_v22, %v1422_v63 }
 0x20d   : > { %1541 = vst.msk [vmem:[#allocation2 + $0x10] sm:$0xff] %vm1538_vm1, %v1524_v4 }
 0x212   : > { %v1485_v56 = vpop.xlane.xlu1 %1484 }
 0x213   : > { %v1525_v7 = vadd.f32 %v1485_v56, %v1423_v28 }
 0x215   : > { %1542 = vst.msk [vmem:[#allocation2 + $0x18] sm:$0xff] %vm1538_vm1, %v1525_v7 }
 0x21a   : > { %v1488_v34 = vpop.xlane.xlu2 %1487 }
 0x21b   : > { %v1526_v41 = vadd.f32 %v1488_v34, %v1424_v21 }
 0x21d   : > { %1543 = vst.msk [vmem:[#allocation2 + $0x20] sm:$0xff] %vm1538_vm1, %v1526_v41 }
 0x222   : > { %v1491_v42 = vpop.xlane.xlu2 %1490 }
 0x223   : > { %v1527_v0 = vadd.f32 %v1491_v42, %v1425_v6 }
 0x225   : > { %1544 = vst.msk [vmem:[#allocation2 + $0x28] sm:$0xff] %vm1538_vm1, %v1527_v0 }
 0x22a   : > { %v1494_v5 = vpop.xlane.xlu0 %1493 }
 0x22b   : > { %v1528_v8 = vadd.f32 %v1494_v5, %v1426_v44 }
 0x22d   : > { %1545 = vst.msk [vmem:[#allocation2 + $0x30] sm:$0xff] %vm1538_vm1, %v1528_v8 }
 0x232   : > { %v1497_v18 = vpop.xlane.xlu1 %1496 }
 0x233   : > { %v1529_v20 = vadd.f32 %v1497_v18, %v1427_v17 }
 0x235   : > { %1546 = vst.msk [vmem:[#allocation2 + $0x38] sm:$0xff] %vm1538_vm1, %v1529_v20 }
 0x23a   : > { %v1500_v23 = vpop.xlane.xlu2 %1499 }
 0x23b   : > { %v1530_v50 = vadd.f32 %v1500_v23, %v1428_v11 }
 0x23d   : > { %1547 = vst.msk [vmem:[#allocation2 + $0x40] sm:$0xff] %vm1538_vm1, %v1530_v50 }
 0x242   : > { %v1503_v24 = vpop.xlane.xlu0 %1502 }
 0x243   : > { %v1531_v15 = vadd.f32 %v1503_v24, %v1429_v51 }
 0x245   : > { %1548 = vst.msk [vmem:[#allocation2 + $0x48] sm:$0xff] %vm1538_vm1, %v1531_v15 }
 0x24a   : > { %v1506_v9 = vpop.xlane.xlu1 %1505 }
 0x24b   : > { %v1532_v10 = vadd.f32 %v1506_v9, %v1430_v27 }
 0x24d   : > { %1549 = vst.msk [vmem:[#allocation2 + $0x50] sm:$0xff] %vm1538_vm1, %v1532_v10 }
 0x252   : > { %v1509_v12 = vpop.xlane.xlu2 %1508 }
 0x253   : > { %v1533_v58 = vadd.f32 %v1509_v12, %v1431_v53 }
 0x255   : > { %1550 = vst.msk [vmem:[#allocation2 + $0x58] sm:$0xff] %vm1538_vm1, %v1533_v58 }
 0x25a   : > { %v1512_v31 = vpop.xlane.xlu0 %1511 }
 0x25b   : > { %v1534_v32 = vadd.f32 %v1512_v31, %v1432_v30 }
 0x25d   : > { %1551 = vst.msk [vmem:[#allocation2 + $0x60] sm:$0xff] %vm1538_vm1, %v1534_v32 }
 0x262   : > { %v1515_v33 = vpop.xlane.xlu1 %1514 }
 0x263   : > { %v1535_v25 = vadd.f32 %v1515_v33, %v1433_v29 }
 0x265   : > { %1552 = vst.msk [vmem:[#allocation2 + $0x68] sm:$0xff] %vm1538_vm1, %v1535_v25 }
 0x26a   : > { %v1518_v19 = vpop.xlane.xlu2 %1517 }
 0x26b   : > { %v1536_v54 = vadd.f32 %v1518_v19, %v1434_v49 }
 0x26d   : > { %1553 = vst.msk [vmem:[#allocation2 + $0x70] sm:$0xff] %vm1538_vm1, %v1536_v54 }
 0x271   : > { %1558 = sbr.rel (%p2678_p9) target bundleno = 846 (0x34e), region = 60 }
 0x272   : > { %v1521_v36 = vpop.xlane.xlu0 %1520 }
 0x273   : > { %v1537_v37 = vadd.f32 %v1521_v36, %v1435_v35 }
 0x275   : > { %1554 = vst.msk [vmem:[#allocation2 + $0x78] sm:$0xff] %vm1538_vm1, %v1537_v37 }
 0x276   : > { %v1559_v13 = vld [vmem:[#allocation2] sm:$0xff]  ;;  %v1561_v47 = vld [vmem:[#allocation2 + $0x10] sm:$0xff]  ;;  %v1560_v45 = vld [vmem:[#allocation2 + $0x8] sm:$0xff]  ;;  %v3844_v46 = vstv %s1575_s11  ;;  %v1977_v43 = vlaneseq  ;;  %v3871_v4 = vstv %s2679_s29 }
 0x277   : > { %v3847_v14 = vadd.f32 %v3844_v46, %v1559_v13  ;;  %v3850_v48 = vadd.f32 %v3844_v46, %v1561_v47  ;;  %v3853_v38 = vadd.f32 %v3844_v46, %v1560_v45  ;;  %v1562_v16 = vld [vmem:[#allocation2 + $0x18] sm:$0xff]  ;;  %v1565_v60 = vld [vmem:[#allocation2 + $0x30] sm:$0xff]  ;;  %v1568_v61 = vld [vmem:[#allocation2 + $0x48] sm:$0xff] }
 0x278   : > { %v3858_v40 = vadd.f32 %v3844_v46, %v1562_v16  ;;  %v1566_v59 = vld [vmem:[#allocation2 + $0x38] sm:$0xff]  ;;  %v3863_v2 = vld [vmem:[%s3341_s19] sm:$0xff]  ;;  %v3865_v62 = vshrl.u32 %v1977_v43, 7  ;;  %v3868_v63 = vadd.f32 %v3844_v46, %v1565_v60  ;;  %v3878_v34 = vadd.f32 %v3844_v46, %v1568_v61  ;;  %v3888_v5 = vld [vmem:[%s3341_s19 + $0x10] sm:$0xff] }
 0x279   : > { %v1593_v39 = vand.u32 2147483647, %v3847_v14  ;;  %v1595_v55 = vand.u32 2147483647, %v3850_v48  ;;  %v1594_v26 = vand.u32 2147483647, %v3853_v38  ;;  %v3875_v21 = vadd.f32 %v3844_v46, %v1566_v59 }
 0x27a   : > { %v1737_v22 = vsub.f32 0.0, %v3847_v14  ;;  %v1596_v56 = vand.u32 2147483647, %v3858_v40  ;;  %v1913_v41 = vsub.f32 1.0, %v3863_v2  ;;  %v1739_v6 = vsub.f32 0.0, %v3850_v48  ;;  %v3891_v8 = vld [vmem:[%s3341_s19 + $0x8] sm:$0xff] }
 0x27b   : > { %v1609_v52 = vsub.f32 0.0, %v1593_v39  ;;  %v1611_v57 = vsub.f32 0.0, %v1595_v55  ;;  %v1610_v3 = vsub.f32 0.0, %v1594_v26  ;;  %v1705_v0 = vmax.f32 %v3847_v14, 0.0  ;;  %v1563_v50 = vld [vmem:[#allocation2 + $0x20] sm:$0xff]  ;;  %v3922_v43 = vld [vmem:[%s3341_s19 + $0x18] sm:$0xff] }
 0x27c   : > { %v1612_v42 = vsub.f32 0.0, %v1596_v56  ;;  %v3885_v44 = vadd.s32 %v3871_v4, %v3865_v62  ;;  %v1599_v17 = vand.u32 2147483647, %v3868_v63  ;;  %v3894_v18 = vmax.f32 %v1737_v22, 0.0  ;;  %v1569_v60 = vld [vmem:[#allocation2 + $0x50] sm:$0xff] }
 0x27d   : > { %v1625_v1 = vmul.f32 1.442695, %v1609_v52  ;;  %v1629_v28 = vmul.f32 1.442695, %v1611_v57  ;;  %v1627_v7 = vmul.f32 1.442695, %v1610_v3  ;;  %v3911_v19 = vadd.f32 %v3844_v46, %v1563_v50 }
 0x27e   : > { %v1707_v20 = vmax.f32 %v3850_v48, 0.0  ;;  %v1738_v11 = vsub.f32 0.0, %v3853_v38  ;;  %v1631_v23 = vmul.f32 1.442695, %v1612_v42  ;;  %v1706_v51 = vmax.f32 %v3853_v38, 0.0  ;;  %v3927_v57 = vld [vmem:[%s3341_s19 + $0x30] sm:$0xff] }
 0x27f   : > { %2887 = vpow2.f32 %v1625_v1  ;;  %v1615_v24 = vsub.f32 0.0, %v1599_v17  ;;  %v1600_v15 = vand.u32 2147483647, %v3875_v21  ;;  %v1602_v27 = vand.u32 2147483647, %v3878_v34 }
 0x280   : > { %2889 = vpow2.f32 %v1629_v28  ;;  %v3901_v9 = vmax.f32 %v1739_v6, 0.0  ;;  %v1915_v10 = vsub.f32 1.0, %v3888_v5  ;;  %v1914_v53 = vsub.f32 1.0, %v3891_v8 }
 0x281   : > { %2891 = vpow2.f32 %v1627_v7  ;;  %v1980_v58 = vadd.s32 16, %v3865_v62  ;;  %v1979_v30 = vadd.s32 8, %v3865_v62  ;;  %v1637_v31 = vmul.f32 1.442695, %v1615_v24 }
 0x282   : > { %2893 = vpow2.f32 %v1631_v23  ;;  %v1616_v32 = vsub.f32 0.0, %v1600_v15  ;;  %v3907_v25 = vmax.f32 %v1738_v11, 0.0  ;;  %v1708_v49 = vmax.f32 %v3858_v40, 0.0 }
 0x283   : > { %2895 = vpow2.f32 %v1637_v31  ;;  %v1618_v37 = vsub.f32 0.0, %v1602_v27  ;;  %v1740_v47 = vsub.f32 0.0, %v3858_v40  ;;  %v1743_v45 = vsub.f32 0.0, %v3868_v63 }
 0x284   : > { %v1639_v36 = vmul.f32 1.442695, %v1616_v32  ;;  %v3916_v16 = vadd.s32 %v3871_v4, %v1980_v58  ;;  %v3919_v39 = vadd.s32 %v3871_v4, %v1979_v30  ;;  %v1981_v55 = vadd.s32 24, %v3865_v62  ;;  %v3949_v58 = vld [vmem:[%s3341_s19 + $0x38] sm:$0xff] }
 0x285   : > { %v2888_v12 = vpop.eup %2887  ;;  %v1711_v26 = vmax.f32 %v3868_v63, 0.0  ;;  %v1984_v59 = vadd.s32 48, %v3865_v62  ;;  %v1744_v61 = vsub.f32 0.0, %v3875_v21  ;;  %v1643_v3 = vmul.f32 1.442695, %v1618_v37 }
 0x286   : > { %v2890_v29 = vpop.eup %2889  ;;  %v1657_v33 = vadd.f32 1.0, %v2888_v12  ;;  %v1597_v22 = vand.u32 2147483647, %v3911_v19  ;;  %v1756_v28 = vmax.f32 %v1740_v47, 0.0  ;;  %v1916_v56 = vsub.f32 1.0, %v3922_v43 }
 0x287   : > { %v2892_v54 = vpop.eup %2891  ;;  %v1659_v35 = vadd.f32 1.0, %v2890_v29  ;;  %v3933_v7 = vmax.f32 %v1743_v45, 0.0  ;;  %v3936_v6 = vadd.f32 %v3844_v46, %v1569_v60  ;;  %v3939_v17 = vadd.s32 %v3871_v4, %v1981_v55 }
 0x288   : > { %2897 = vlog2.f32 %v1657_v33  ;;  %v1658_v13 = vadd.f32 1.0, %v2892_v54  ;;  %v2894_v52 = vpop.eup %2893  ;;  %v1919_v11 = vsub.f32 1.0, %v3927_v57  ;;  %v1613_v23 = vsub.f32 0.0, %v1597_v22 }
 0x289   : > { %2899 = vlog2.f32 %v1659_v35  ;;  %v1660_v1 = vadd.f32 1.0, %v2894_v52  ;;  %v2896_v42 = vpop.eup %2895  ;;  %v3943_v15 = vadd.s32 %v3871_v4, %v1984_v59  ;;  %v1712_v27 = vmax.f32 %v3875_v21, 0.0 }
 0x28a   : > { %2901 = vlog2.f32 %v1658_v13  ;;  %v1663_v24 = vadd.f32 1.0, %v2896_v42  ;;  %v3946_v12 = vmax.f32 %v1744_v61, 0.0  ;;  %v1714_v32 = vmax.f32 %v3878_v34, 0.0 }
 0x28b   : > { %2903 = vpow2.f32 %v1639_v36  ;;  %v1633_v29 = vmul.f32 1.442695, %v1613_v23  ;;  %v1746_v35 = vsub.f32 0.0, %v3878_v34  ;;  %v1603_v36 = vand.u32 2147483647, %v3936_v6 }
 0x28c   : > { %2905 = vlog2.f32 %v1660_v1  ;;  %v1920_v55 = vsub.f32 1.0, %v3949_v58  ;;  %vm2012_vm2 = vcmp.lt.s32.totalorder %v3885_v44, 256  ;;  %vm2014_vm3 = vcmp.lt.s32.totalorder %v3916_v16, 256 }
 0x28d   : > { %2907 = vpow2.f32 %v1643_v3  ;;  %vm2013_vm4 = vcmp.lt.s32.totalorder %v3919_v39, 256  ;;  %vm2015_vm5 = vcmp.lt.s32.totalorder %v3939_v17, 256  ;;  %v1619_v21 = vsub.f32 0.0, %v1603_v36  ;;  %v1564_v17 = vld [vmem:[#allocation2 + $0x28] sm:$0xff] }
 0x28e   : > { %v2898_v50 = vpop.eup %2897  ;;  %2909 = vlog2.f32 %v1663_v24  ;;  %vm2018_vm6 = vcmp.lt.s32.totalorder %v3943_v15, 256 }
 0x28f   : > { %v2900_v30 = vpop.eup %2899  ;;  %v1674_v31 = vmul.f32 0.6931472, %v2898_v50  ;;  %2911 = vpow2.f32 %v1633_v29 }
 0x290   : > { %v2902_v33 = vpop.eup %2901  ;;  %v1678_v54 = vmul.f32 0.6931472, %v2900_v30 }
 0x291   : > { %v2904_v37 = vpop.eup %2903  ;;  %v1721_v13 = vadd.f32 %v1705_v0, %v1674_v31  ;;  %v3957_v47 = vadd.f32 %v3894_v18, %v1674_v31  ;;  %v1676_v45 = vmul.f32 0.6931472, %v2902_v33 }
 0x292   : > { %v1723_v60 = vadd.f32 %v1707_v20, %v1678_v54  ;;  %v3964_v52 = vadd.f32 %v3901_v9, %v1678_v54  ;;  %v1664_v59 = vadd.f32 1.0, %v2904_v37  ;;  %v2906_v61 = vpop.eup %2905 }
 0x293   : > { %v1785_v14 = vsub.f32 0.0, %v3957_v47  ;;  %v1849_v0 = vsub.f32 0.0, %v1721_v13  ;;  %v1722_v18 = vadd.f32 %v1706_v51, %v1676_v45  ;;  %v3971_v1 = vadd.f32 %v3907_v25, %v1676_v45  ;;  %v2908_v9 = vpop.eup %2907 }
 0x294   : > { %v1787_v48 = vsub.f32 0.0, %v3964_v52  ;;  %v1851_v20 = vsub.f32 0.0, %v1723_v60  ;;  %v1680_v3 = vmul.f32 0.6931472, %v2906_v61  ;;  %2913 = vlog2.f32 %v1664_v59  ;;  %v2910_v24 = vpop.eup %2909 }
 0x295   : > { %v1833_v22 = vmax.f32 %v1785_v14, -100.0  ;;  %v1865_v42 = vmax.f32 %v1849_v0, -100.0  ;;  %v1786_v23 = vsub.f32 0.0, %v3971_v1  ;;  %v1850_v50 = vsub.f32 0.0, %v1722_v18  ;;  %v2912_v37 = vpop.eup %2911 }
 0x296   : > { %v1835_v38 = vmax.f32 %v1787_v48, -100.0  ;;  %v1867_v51 = vmax.f32 %v1851_v20, -100.0  ;;  %v1724_v25 = vadd.f32 %v1708_v49, %v1680_v3  ;;  %v3981_v30 = vadd.f32 %v1756_v28, %v1680_v3 }
 0x297   : > { %v1897_v31 = vmul.f32 %v3863_v2, %v1833_v22  ;;  %v1929_v29 = vmul.f32 %v1913_v41, %v1865_v42  ;;  %v1834_v33 = vmax.f32 %v1786_v23, -100.0  ;;  %v1866_v54 = vmax.f32 %v1850_v50, -100.0 }
 0x298   : > { %v1899_v13 = vmul.f32 %v3888_v5, %v1835_v38  ;;  %v1931_v45 = vmul.f32 %v1915_v10, %v1867_v51  ;;  %v1788_v40 = vsub.f32 0.0, %v3981_v30  ;;  %v1852_v49 = vsub.f32 0.0, %v1724_v25 }
 0x299   : > { %v1945_v28 = vadd.f32 %v1929_v29, %v1897_v31  ;;  %v1898_v60 = vmul.f32 %v3891_v8, %v1834_v33  ;;  %v1930_v2 = vmul.f32 %v1914_v53, %v1866_v54  ;;  %v1686_v41 = vmul.f32 0.6931472, %v2910_v24  ;;  %v1571_v31 = vld [vmem:[#allocation2 + $0x60] sm:$0xff] }
 0x29a   : > { %v2914_v59 = vpop.eup %2913  ;;  %v1947_v61 = vadd.f32 %v1931_v45, %v1899_v13  ;;  %v1836_v5 = vmax.f32 %v1788_v40, -100.0  ;;  %v1868_v10 = vmax.f32 %v1852_v49, -100.0  ;;  %v1666_v0 = vadd.f32 1.0, %v2908_v9 }
 0x29b   : > { %v1961_v18 = vsub.f32 0.0, %v1945_v28  ;;  %v1946_v20 = vadd.f32 %v1930_v2, %v1898_v60  ;;  %v1727_v3 = vadd.f32 %v1711_v26, %v1686_v41  ;;  %v4002_v22 = vadd.f32 %v3933_v7, %v1686_v41 }
 0x29c   : > { %v1963_v8 = vsub.f32 0.0, %v1947_v61  ;;  %v1900_v53 = vmul.f32 %v3922_v43, %v1836_v5  ;;  %v1932_v42 = vmul.f32 %v1916_v56, %v1868_v10  ;;  %v1688_v50 = vmul.f32 0.6931472, %v2914_v59  ;;  %v1890_v5 = vld [vmem:[%s3341_s19 + $0x48] sm:$0xff] }
 0x29d   : > { %v2028_v24 = vsel %vm2012_vm2, %v1961_v18, 0.0  ;;  %v1791_v9 = vsub.f32 0.0, %v4002_v22  ;;  %v1855_v38 = vsub.f32 0.0, %v1727_v3  ;;  %v1985_v51 = vadd.s32 56, %v3865_v62 }
 0x29e   : > { %2076 = vrot.lane.b32.xlu0 %v2028_v24, %s3144_s30  ;;  %v2030_v63 = vsel %vm2014_vm3, %v1963_v8, 0.0  ;;  %v1948_v26 = vadd.f32 %v1932_v42, %v1900_v53  ;;  %v1728_v43 = vadd.f32 %v1712_v27, %v1688_v50  ;;  %v4017_v56 = vadd.f32 %v3946_v12, %v1688_v50  ;;  %v1885_v53 = vld [vmem:[%s3341_s19 + $0x20] sm:$0xff] }
 0x29f   : > { %2080 = vrot.lane.b32.xlu1 %v2030_v63, %s3144_s30  ;;  %v1962_v44 = vsub.f32 0.0, %v1946_v20  ;;  %v1839_v7 = vmax.f32 %v1791_v9, -100.0  ;;  %v1871_v25 = vmax.f32 %v1855_v38, -100.0  ;;  %2915 = vlog2.f32 %v1666_v0 }
 0x2a0   : > { %v1964_v29 = vsub.f32 0.0, %v1948_v26  ;;  %v1792_v16 = vsub.f32 0.0, %v4017_v56  ;;  %v1856_v33 = vsub.f32 0.0, %v1728_v43  ;;  %v1762_v54 = vmax.f32 %v1746_v35, 0.0 }
 0x2a1   : > { %v1903_v27 = vmul.f32 %v3927_v57, %v1839_v7  ;;  %v1935_v12 = vmul.f32 %v1919_v11, %v1871_v25  ;;  %v1661_v13 = vadd.f32 1.0, %v2912_v37  ;;  %v1741_v28 = vsub.f32 0.0, %v3911_v19 }
 0x2a2   : > { %v1840_v45 = vmax.f32 %v1792_v16, -100.0  ;;  %v1872_v49 = vmax.f32 %v1856_v33, -100.0  ;;  %v4034_v60 = vadd.f32 %v3844_v46, %v1571_v31  ;;  %v2029_v36 = vsel %vm2013_vm4, %v1962_v44, 0.0 }
 0x2a3   : > { %v1951_v2 = vadd.f32 %v1935_v12, %v1903_v27  ;;  %v2003_v57 = vadd.s32 %v3871_v4, %v1985_v51  ;;  %2917 = vlog2.f32 %v1661_v13  ;;  %v2031_v11 = vsel %vm2015_vm5, %v1964_v29, 0.0 }
 0x2a4   : > { %v1904_v35 = vmul.f32 %v3949_v58, %v1840_v45  ;;  %v1936_v37 = vmul.f32 %v1920_v55, %v1872_v49  ;;  %v1645_v41 = vmul.f32 1.442695, %v1619_v21  ;;  %v1987_v10 = vadd.s32 72, %v3865_v62  ;;  %v1572_v49 = vld [vmem:[#allocation2 + $0x68] sm:$0xff] }
 0x2a5   : > { %v2916_v59 = vpop.eup %2915  ;;  %v1967_v0 = vsub.f32 0.0, %v1951_v2  ;;  %vm2019_vm7 = vcmp.lt.s32.totalorder %v2003_v57, 256  ;;  %v1709_v58 = vmax.f32 %v3911_v19, 0.0  ;;  %v1605_v55 = vand.u32 2147483647, %v4034_v60 }
 0x2a6   : > { %2078 = vrot.lane.b32.xlu0 %v2029_v36, %s3144_s30  ;;  %v1952_v39 = vadd.f32 %v1936_v37, %v1904_v35  ;;  %v1692_v61 = vmul.f32 0.6931472, %v2916_v59  ;;  %2919 = vpow2.f32 %v1645_v41  ;;  %v1757_v8 = vmax.f32 %v1741_v28, 0.0 }
 0x2a7   : > { %2082 = vrot.lane.b32.xlu1 %v2031_v11, %s3144_s30  ;;  %v1922_v50 = vsub.f32 1.0, %v1890_v5  ;;  %v1621_v24 = vsub.f32 0.0, %v1605_v55  ;;  %v4057_v38 = vadd.f32 %v3844_v46, %v1564_v17  ;;  %v2005_v19 = vadd.s32 %v3871_v4, %v1987_v10 }
 0x2a8   : > { %v1968_v18 = vsub.f32 0.0, %v1952_v39  ;;  %v1730_v20 = vadd.f32 %v1714_v32, %v1692_v61  ;;  %v4053_v3 = vadd.f32 %v1762_v54, %v1692_v61  ;;  %v2034_v34 = vsel %vm2018_vm6, %v1967_v0, 0.0 }
 0x2a9   : > { %v2918_v42 = vpop.eup %2917  ;;  %v1917_v43 = vsub.f32 1.0, %v1885_v53  ;;  %v1649_v44 = vmul.f32 1.442695, %v1621_v24  ;;  %v1982_v21 = vadd.s32 32, %v3865_v62  ;;  %v1598_v12 = vand.u32 2147483647, %v4057_v38 }
 0x2aa   : > { %v1794_v51 = vsub.f32 0.0, %v4053_v3  ;;  %v1858_v63 = vsub.f32 0.0, %v1730_v20  ;;  %v1682_v26 = vmul.f32 0.6931472, %v2918_v42  ;;  %v2035_v32 = vsel %vm2019_vm7, %v1968_v18, 0.0  ;;  %v1574_v20 = vld [vmem:[#allocation2 + $0x78] sm:$0xff] }
 0x2ab   : > { %2921 = vpow2.f32 %v1649_v44  ;;  %v1614_v28 = vsub.f32 0.0, %v1598_v12  ;;  %v1747_v11 = vsub.f32 0.0, %v3936_v6  ;;  %vm2021_vm8 = vcmp.lt.s32.totalorder %v2005_v19, 256  ;;  %v1567_v44 = vld [vmem:[#allocation2 + $0x40] sm:$0xff] }
 0x2ac   : > { %v2920_v7 = vpop.eup %2919  ;;  %v1842_v25 = vmax.f32 %v1794_v51, -100.0  ;;  %v1874_v31 = vmax.f32 %v1858_v63, -100.0  ;;  %v1725_v29 = vadd.f32 %v1709_v58, %v1682_v26  ;;  %v4066_v33 = vadd.f32 %v1757_v8, %v1682_v26  ;;  %v1891_v63 = vld [vmem:[%s3341_s19 + $0x50] sm:$0xff] }
 0x2ad   : > { %v1667_v27 = vadd.f32 1.0, %v2920_v7  ;;  %v2000_v35 = vadd.s32 %v3871_v4, %v1982_v21  ;;  %v1635_v37 = vmul.f32 1.442695, %v1614_v28  ;;  %v4078_v41 = vadd.f32 %v3844_v46, %v1572_v49 }
 0x2ae   : > { %2088 = vrot.lane.b32.xlu0 %v2034_v34, %s3144_s30  ;;  %v1906_v15 = vmul.f32 %v1890_v5, %v1842_v25  ;;  %v1938_v54 = vmul.f32 %v1922_v50, %v1874_v31  ;;  %v1789_v13 = vsub.f32 0.0, %v4066_v33  ;;  %v1853_v45 = vsub.f32 0.0, %v1725_v29  ;;  %v1893_v29 = vld [vmem:[%s3341_s19 + $0x60] sm:$0xff] }
 0x2af   : > { %2090 = vrot.lane.b32.xlu1 %v2035_v32, %s3144_s30  ;;  %2923 = vlog2.f32 %v1667_v27  ;;  %v1715_v10 = vmax.f32 %v3936_v6, 0.0  ;;  %v1606_v17 = vand.u32 2147483647, %v4078_v41  ;;  %v1763_v55 = vmax.f32 %v1747_v11, 0.0 }
 0x2b0   : > { %v1954_v36 = vadd.f32 %v1938_v54, %v1906_v15  ;;  %v1837_v2 = vmax.f32 %v1789_v13, -100.0  ;;  %v1869_v57 = vmax.f32 %v1853_v45, -100.0  ;;  %2925 = vpow2.f32 %v1635_v37  ;;  %v1570_v45 = vld [vmem:[#allocation2 + $0x58] sm:$0xff] }
 0x2b1   : > { %v2922_v5 = vpop.eup %2921  ;;  %vm2016_vm9 = vcmp.lt.s32.totalorder %v2000_v35, 256  ;;  %v1988_v42 = vadd.s32 80, %v3865_v62  ;;  %v1622_v50 = vsub.f32 0.0, %v1606_v17  ;;  %v1749_v6 = vsub.f32 0.0, %v4034_v60 }
 0x2b2   : > { %v1970_v59 = vsub.f32 0.0, %v1954_v36  ;;  %v1901_v39 = vmul.f32 %v1885_v53, %v1837_v2  ;;  %v1933_v61 = vmul.f32 %v1917_v43, %v1869_v57  ;;  %v1669_v18 = vadd.f32 1.0, %v2922_v5 }
 0x2b3   : > { %v1651_v19 = vmul.f32 1.442695, %v1622_v50  ;;  %v4087_v26 = vadd.f32 %v3844_v46, %v1574_v20  ;;  %v1923_v25 = vsub.f32 1.0, %v1891_v63  ;;  %v2006_v31 = vadd.s32 %v3871_v4, %v1988_v42 }
 0x2b4   : > { %v2037_v0 = vsel %vm2021_vm8, %v1970_v59, 0.0  ;;  %v1949_v58 = vadd.f32 %v1933_v61, %v1901_v39  ;;  %2927 = vlog2.f32 %v1669_v18  ;;  %v1717_v15 = vmax.f32 %v4034_v60, 0.0 }
 0x2b5   : > { %v2924_v8 = vpop.eup %2923  ;;  %2929 = vpow2.f32 %v1651_v19  ;;  %v1608_v21 = vand.u32 2147483647, %v4087_v26  ;;  %v1765_v49 = vmax.f32 %v1749_v6, 0.0  ;;  %v1990_v28 = vadd.s32 96, %v3865_v62 }
 0x2b6   : > { %2094 = vrot.lane.b32.xlu0 %v2037_v0, %s3144_s30  ;;  %v1965_v53 = vsub.f32 0.0, %v1949_v58  ;;  %v1694_v24 = vmul.f32 0.6931472, %v2924_v8  ;;  %v2926_v7 = vpop.eup %2925  ;;  %v4099_v2 = vadd.f32 %v3844_v46, %v1567_v44  ;;  %v1925_v37 = vsub.f32 1.0, %v1893_v29 }
 0x2b7   : > { %v1662_v54 = vadd.f32 1.0, %v2926_v7  ;;  %v1624_v36 = vsub.f32 0.0, %v1608_v21  ;;  %v1742_v39 = vsub.f32 0.0, %v4057_v38  ;;  %v4105_v61 = vadd.f32 %v3844_v46, %v1570_v45  ;;  %v1886_v21 = vld [vmem:[%s3341_s19 + $0x28] sm:$0xff] }
 0x2b8   : > { %v2032_v34 = vsel %vm2016_vm9, %v1965_v53, 0.0  ;;  %v1731_v32 = vadd.f32 %v1715_v10, %v1694_v24  ;;  %v4089_v43 = vadd.f32 %v1763_v55, %v1694_v24  ;;  %vm2022_vm10 = vcmp.lt.s32.totalorder %v2006_v31, 256 }
 0x2b9   : > { %2084 = vrot.lane.b32.xlu2 %v2032_v34, %s3144_s30  ;;  %2931 = vlog2.f32 %v1662_v54  ;;  %v1655_v60 = vmul.f32 1.442695, %v1624_v36  ;;  %v1601_v17 = vand.u32 2147483647, %v4099_v2  ;;  %v2008_v18 = vadd.s32 %v3871_v4, %v1990_v28 }
 0x2ba   : > { %v1795_v27 = vsub.f32 0.0, %v4089_v43  ;;  %v1859_v12 = vsub.f32 0.0, %v1731_v32  ;;  %v2928_v57 = vpop.eup %2927  ;;  %v1710_v8 = vmax.f32 %v4057_v38, 0.0  ;;  %v1604_v6 = vand.u32 2147483647, %v4105_v61 }
 0x2bb   : > { %v1698_v59 = vmul.f32 0.6931472, %v2928_v57  ;;  %v2930_v0 = vpop.eup %2929  ;;  %2933 = vpow2.f32 %v1655_v60  ;;  %v1617_v50 = vsub.f32 0.0, %v1601_v17  ;;  %vm2024_vm11 = vcmp.lt.s32.totalorder %v2008_v18, 256  ;;  %v1573_v57 = vld [vmem:[#allocation2 + $0x70] sm:$0xff]  ;;  %v1894_v17 = vld [vmem:[%s3341_s19 + $0x68] sm:$0xff] }
 0x2bc   : > { %v1843_v11 = vmax.f32 %v1795_v27, -100.0  ;;  %v1875_v35 = vmax.f32 %v1859_v12, -100.0  ;;  %v1670_v42 = vadd.f32 1.0, %v2930_v0  ;;  %v1750_v12 = vsub.f32 0.0, %v4078_v41 }
 0x2bd   : > { %v1733_v58 = vadd.f32 %v1717_v15, %v1698_v59  ;;  %v4108_v55 = vadd.f32 %v1765_v49, %v1698_v59  ;;  %v1641_v32 = vmul.f32 1.442695, %v1617_v50  ;;  %v1620_v15 = vsub.f32 0.0, %v1604_v6 }
 0x2be   : > { %v1907_v5 = vmul.f32 %v1891_v63, %v1843_v11  ;;  %v1939_v10 = vmul.f32 %v1923_v25, %v1875_v35  ;;  %v1758_v63 = vmax.f32 %v1742_v39, 0.0  ;;  %2935 = vlog2.f32 %v1670_v42 }
 0x2bf   : > { %v1797_v53 = vsub.f32 0.0, %v4108_v55  ;;  %v1861_v24 = vsub.f32 0.0, %v1733_v58  ;;  %v2932_v19 = vpop.eup %2931  ;;  %2937 = vpow2.f32 %v1641_v32  ;;  %v1918_v11 = vsub.f32 1.0, %v1886_v21 }
 0x2c0   : > { %v1955_v20 = vadd.f32 %v1939_v10, %v1907_v5  ;;  %v1684_v25 = vmul.f32 0.6931472, %v2932_v19  ;;  %v1983_v35 = vadd.s32 40, %v3865_v62  ;;  %v1647_v31 = vmul.f32 1.442695, %v1620_v15 }
 0x2c1   : > { %v1845_v44 = vmax.f32 %v1797_v53, -100.0  ;;  %v1877_v7 = vmax.f32 %v1861_v24, -100.0  ;;  %v2934_v54 = vpop.eup %2933  ;;  %v1718_v10 = vmax.f32 %v4078_v41, 0.0  ;;  %v1766_v58 = vmax.f32 %v1750_v12, 0.0 }
 0x2c2   : > { %v1971_v34 = vsub.f32 0.0, %v1955_v20  ;;  %v1726_v28 = vadd.f32 %v1710_v8, %v1684_v25  ;;  %v4120_v36 = vadd.f32 %v1758_v63, %v1684_v25  ;;  %v1672_v59 = vadd.f32 1.0, %v2934_v54 }
 0x2c3   : > { %v1909_v45 = vmul.f32 %v1893_v29, %v1845_v44  ;;  %v1941_v49 = vmul.f32 %v1925_v37, %v1877_v7  ;;  %v1752_v29 = vsub.f32 0.0, %v4087_v26  ;;  %v4128_v37 = vadd.f32 %v3844_v46, %v1573_v57 }
 0x2c4   : > { %v2038_v38 = vsel %vm2022_vm10, %v1971_v34, 0.0  ;;  %v1790_v60 = vsub.f32 0.0, %v4120_v36  ;;  %v1854_v5 = vsub.f32 0.0, %v1726_v28  ;;  %v2936_v0 = vpop.eup %2935  ;;  %2939 = vlog2.f32 %v1672_v59 }
 0x2c5   : > { %2096 = vrot.lane.b32.xlu1 %v2038_v38, %s3144_s30  ;;  %v1957_v39 = vadd.f32 %v1941_v49, %v1909_v45  ;;  %v1700_v50 = vmul.f32 0.6931472, %v2936_v0  ;;  %v2938_v24 = vpop.eup %2937  ;;  %v2001_v63 = vadd.s32 %v3871_v4, %v1983_v35  ;;  %v1926_v6 = vsub.f32 1.0, %v1894_v17  ;;  %v1896_v35 = vld [vmem:[%s3341_s19 + $0x78] sm:$0xff] }
 0x2c6   : > { %v1838_v8 = vmax.f32 %v1790_v60, -100.0  ;;  %v1870_v42 = vmax.f32 %v1854_v5, -100.0  ;;  %2941 = vpow2.f32 %v1647_v31  ;;  %v1607_v41 = vand.u32 2147483647, %v4128_v37 }
 0x2c7   : > { %v1973_v20 = vsub.f32 0.0, %v1957_v39  ;;  %v1734_v44 = vadd.f32 %v1718_v10, %v1700_v50  ;;  %v4136_v46 = vadd.f32 %v1766_v58, %v1700_v50  ;;  %v1991_v7 = vadd.s32 104, %v3865_v62 }
 0x2c8   : > { %v1902_v34 = vmul.f32 %v1886_v21, %v1838_v8  ;;  %v1934_v32 = vmul.f32 %v1918_v11, %v1870_v42  ;;  %v1665_v25 = vadd.f32 1.0, %v2938_v24  ;;  %v1623_v38 = vsub.f32 0.0, %v1607_v41 }
 0x2c9   : > { %v2040_v19 = vsel %vm2024_vm11, %v1973_v20, 0.0  ;;  %v1862_v15 = vsub.f32 0.0, %v1734_v44  ;;  %v1720_v54 = vmax.f32 %v4087_v26, 0.0  ;;  %v1768_v45 = vmax.f32 %v1752_v29, 0.0 }
 0x2ca   : > { %2100 = vrot.lane.b32.xlu0 %v2040_v19, %s3144_s30  ;;  %v1950_v12 = vadd.f32 %v1934_v32, %v1902_v34  ;;  %v2940_v49 = vpop.eup %2939  ;;  %vm2017_vm12 = vcmp.lt.s32.totalorder %v2001_v63, 256  ;;  %v1798_v18 = vsub.f32 0.0, %v4136_v46  ;;  %2943 = vlog2.f32 %v1665_v25 }
 0x2cb   : > { %v1653_v21 = vmul.f32 1.442695, %v1623_v38  ;;  %v1878_v57 = vmax.f32 %v1862_v15, -100.0  ;;  %v1704_v11 = vmul.f32 0.6931472, %v2940_v49  ;;  %v1745_v59 = vsub.f32 0.0, %v4099_v2 }
 0x2cc   : > { %v1966_v28 = vsub.f32 0.0, %v1950_v12  ;;  %v2942_v31 = vpop.eup %2941  ;;  %v1846_v39 = vmax.f32 %v1798_v18, -100.0  ;;  %v2009_v5 = vadd.s32 %v3871_v4, %v1991_v7  ;;  %v1928_v20 = vsub.f32 1.0, %v1896_v35  ;;  %v1889_v7 = vld [vmem:[%s3341_s19 + $0x40] sm:$0xff] }
 0x2cd   : > { %2945 = vpow2.f32 %v1653_v21  ;;  %v1942_v10 = vmul.f32 %v1926_v6, %v1878_v57  ;;  %v1736_v0 = vadd.f32 %v1720_v54, %v1704_v11  ;;  %v4146_v58 = vadd.f32 %v1768_v45, %v1704_v11 }
 0x2ce   : > { %v2033_v26 = vsel %vm2017_vm12, %v1966_v28, 0.0  ;;  %v1910_v29 = vmul.f32 %v1894_v17, %v1846_v39  ;;  %v1993_v8 = vadd.s32 120, %v3865_v62  ;;  %v1668_v42 = vadd.f32 1.0, %v2942_v31 }
 0x2cf   : > { %2086 = vrot.lane.b32.xlu2 %v2033_v26, %s3144_s30  ;;  %v1800_v50 = vsub.f32 0.0, %v4146_v58  ;;  %v1864_v24 = vsub.f32 0.0, %v1736_v0  ;;  %v1713_v63 = vmax.f32 %v4099_v2, 0.0  ;;  %v1761_v41 = vmax.f32 %v1745_v59, 0.0 }
 0x2d0   : > { %v2944_v19 = vpop.eup %2943  ;;  %v1958_v34 = vadd.f32 %v1942_v10, %v1910_v29  ;;  %2947 = vlog2.f32 %v1668_v42  ;;  %v1801_v6 = vmul.f32 1.442695, %v1785_v14  ;;  %vm2025_vm13 = vcmp.lt.s32.totalorder %v2009_v5, 256 }
 0x2d1   : > { %v1848_v17 = vmax.f32 %v1800_v50, -100.0  ;;  %v1880_v32 = vmax.f32 %v1864_v24, -100.0  ;;  %v1690_v44 = vmul.f32 0.6931472, %v2944_v19  ;;  %v2011_v12 = vadd.s32 %v3871_v4, %v1993_v8 }
 0x2d2   : > { %v1974_v38 = vsub.f32 0.0, %v1958_v34  ;;  %v1748_v2 = vsub.f32 0.0, %v4105_v61  ;;  %2949 = vpow2.f32 %v1801_v6  ;;  %v1921_v14 = vsub.f32 1.0, %v1889_v7 }
 0x2d3   : > { %v2946_v25 = vpop.eup %2945  ;;  %v1912_v15 = vmul.f32 %v1896_v35, %v1848_v17  ;;  %v1944_v54 = vmul.f32 %v1928_v20, %v1880_v32  ;;  %v1729_v45 = vadd.f32 %v1713_v63, %v1690_v44  ;;  %v4159_v49 = vadd.f32 %v1761_v41, %v1690_v44  ;;  %v1892_v20 = vld [vmem:[%s3341_s19 + $0x58] sm:$0xff] }
 0x2d4   : > { %v2041_v47 = vsel %vm2025_vm13, %v1974_v38, 0.0  ;;  %v1986_v21 = vadd.s32 64, %v3865_v62  ;;  %v1671_v28 = vadd.f32 1.0, %v2946_v25  ;;  %v1716_v31 = vmax.f32 %v4105_v61, 0.0 }
 0x2d5   : > { %2102 = vrot.lane.b32.xlu1 %v2041_v47, %s3144_s30  ;;  %v1960_v57 = vadd.f32 %v1944_v54, %v1912_v15  ;;  %v1793_v11 = vsub.f32 0.0, %v4159_v49  ;;  %v1857_v59 = vsub.f32 0.0, %v1729_v45  ;;  %vm2027_vm14 = vcmp.lt.s32.totalorder %v2011_v12, 256  ;;  %v1895_v47 = vld [vmem:[%s3341_s19 + $0x70] sm:$0xff] }
 0x2d6   : > { %v2948_v39 = vpop.eup %2947  ;;  %v1764_v35 = vmax.f32 %v1748_v2, 0.0  ;;  %2951 = vlog2.f32 %v1671_v28  ;;  %v1751_v5 = vsub.f32 0.0, %v4128_v37  ;;  %v2004_v42 = vadd.s32 %v3871_v4, %v1986_v21 }
 0x2d7   : > { %v1976_v26 = vsub.f32 0.0, %v1960_v57  ;;  %v1841_v10 = vmax.f32 %v1793_v11, -100.0  ;;  %v1873_v0 = vmax.f32 %v1857_v59, -100.0  ;;  %v1696_v29 = vmul.f32 0.6931472, %v2948_v39 }
 0x2d8   : > { %v2950_v8 = vpop.eup %2949  ;;  %v1924_v34 = vsub.f32 1.0, %v1892_v20  ;;  %v1989_v6 = vadd.s32 88, %v3865_v62  ;;  %v1719_v44 = vmax.f32 %v4128_v37, 0.0  ;;  %v1767_v25 = vmax.f32 %v1751_v5, 0.0 }
 0x2d9   : > { %v2043_v24 = vsel %vm2027_vm14, %v1976_v26, 0.0  ;;  %v1905_v63 = vmul.f32 %v1889_v7, %v1841_v10  ;;  %v1937_v61 = vmul.f32 %v1921_v14, %v1873_v0  ;;  %v1732_v41 = vadd.f32 %v1716_v31, %v1696_v29  ;;  %2044 = vst.msk [vmem:[%s3354_s2] sm:$0xff] %vm1538_vm1, %v2950_v8 }
 0x2da   : > { %2106 = vrot.lane.b32.xlu0 %v2043_v24, %s3144_s30  ;;  %v4173_v19 = vadd.f32 %v1764_v35, %v1696_v29  ;;  %vm2020_vm15 = vcmp.lt.s32.totalorder %v2004_v42, 256  ;;  %v2007_v45 = vadd.s32 %v3871_v4, %v1989_v6  ;;  %v1927_v39 = vsub.f32 1.0, %v1895_v47 }
 0x2db   : > { %v1953_v17 = vadd.f32 %v1937_v61, %v1905_v63  ;;  %v1860_v32 = vsub.f32 0.0, %v1732_v41  ;;  %v1992_v5 = vadd.s32 112, %v3865_v62  ;;  %v1809_v61 = vmul.f32 1.442695, %v1789_v13 }
 0x2dc   : > { %v2952_v38 = vpop.eup %2951  ;;  %v1796_v7 = vsub.f32 0.0, %v4173_v19  ;;  %vm2023_vm0 = vcmp.lt.s32.totalorder %v2007_v45, 256  ;;  %v1805_v41 = vmul.f32 1.442695, %v1787_v48  ;;  %v1811_v6 = vmul.f32 1.442695, %v1790_v60 }
 0x2dd   : > { %v1969_v12 = vsub.f32 0.0, %v1953_v17  ;;  %v1876_v2 = vmax.f32 %v1860_v32, -100.0  ;;  %v1702_v15 = vmul.f32 0.6931472, %v2952_v38  ;;  %v2010_v24 = vadd.s32 %v3871_v4, %v1992_v5 }
 0x2de   : > { %v1844_v54 = vmax.f32 %v1796_v7, -100.0  ;;  %2953 = vpow2.f32 %v1809_v61  ;;  %v1803_v4 = vmul.f32 1.442695, %v1786_v23  ;;  %v1807_v1 = vmul.f32 1.442695, %v1788_v40 }
 0x2df   : > { %v2036_v14 = vsel %vm2020_vm15, %v1969_v12, 0.0  ;;  %v1940_v21 = vmul.f32 %v1924_v34, %v1876_v2  ;;  %v1735_v28 = vadd.f32 %v1719_v44, %v1702_v15  ;;  %v4182_v57 = vadd.f32 %v1767_v25, %v1702_v15 }
 0x2e0   : > { %2092 = vrot.lane.b32.xlu2 %v2036_v14, %s3144_s30  ;;  %v1908_v37 = vmul.f32 %v1892_v20, %v1844_v54  ;;  %vm2026_vm2 = vcmp.lt.s32.totalorder %v2010_v24, 256  ;;  %2955 = vpow2.f32 %v1805_v41  ;;  %v1813_v48 = vmul.f32 1.442695, %v1791_v9 }
 0x2e1   : > { %v1799_v59 = vsub.f32 0.0, %v4182_v57  ;;  %v1863_v31 = vsub.f32 0.0, %v1735_v28  ;;  %2957 = vpow2.f32 %v1803_v4  ;;  %v1817_v23 = vmul.f32 1.442695, %v1793_v11 }
 0x2e2   : > { %v1956_v35 = vadd.f32 %v1940_v21, %v1908_v37  ;;  %2959 = vpow2.f32 %v1811_v6  ;;  %vm2124_vm3 = vcmask 15368   ;;  %v1815_v49 = vmul.f32 1.442695, %v1792_v16 }
 0x2e3   : > { %v1847_v26 = vmax.f32 %v1799_v59, -100.0  ;;  %v1879_v10 = vmax.f32 %v1863_v31, -100.0  ;;  %2961 = vpow2.f32 %v1807_v1  ;;  %v1819_v11 = vmul.f32 1.442695, %v1794_v51 }
 0x2e4   : > { %v1972_v0 = vsub.f32 0.0, %v1956_v35  ;;  %v2954_v34 = vpop.eup %2953  ;;  %2963 = vpow2.f32 %v1813_v48  ;;  %v1823_v56 = vmul.f32 1.442695, %v1796_v7  ;;  %v1821_v16 = vmul.f32 1.442695, %v1795_v27 }
 0x2e5   : > { %v1911_v29 = vmul.f32 %v1895_v47, %v1847_v26  ;;  %v1943_v8 = vmul.f32 %v1927_v39, %v1879_v10  ;;  %2048 = vst.msk [vmem:[%s3354_s2 + $0x20] sm:$0xff] %vm1538_vm1, %v2954_v34  ;;  %2965 = vpow2.f32 %v1817_v23  ;;  %v1825_v3 = vmul.f32 1.442695, %v1797_v53 }
 0x2e6   : > { %v2039_v42 = vsel %vm2023_vm0, %v1972_v0, 0.0  ;;  %v2956_v33 = vpop.eup %2955  ;;  %2967 = vpow2.f32 %v1815_v49  ;;  %v1829_v27 = vmul.f32 1.442695, %v1799_v59  ;;  %v1827_v55 = vmul.f32 1.442695, %v1798_v18 }
 0x2e7   : > { %v1959_v20 = vadd.f32 %v1943_v8, %v1911_v29  ;;  %v2958_v13 = vpop.eup %2957  ;;  %2046 = vst.msk [vmem:[%s3354_s2 + $0x10] sm:$0xff] %vm1538_vm1, %v2956_v33  ;;  %2969 = vpow2.f32 %v1819_v11  ;;  %v1831_v53 = vmul.f32 1.442695, %v1800_v50 }
 0x2e8   : > { %2098 = vrot.lane.b32.xlu2 %v2039_v42, %s3144_s30  ;;  %2045 = vst.msk [vmem:[%s3354_s2 + $0x8] sm:$0xff] %vm1538_vm1, %v2958_v13  ;;  %v2960_v52 = vpop.eup %2959  ;;  %2971 = vpow2.f32 %v1823_v56 }
 0x2e9   : > { %v1975_v63 = vsub.f32 0.0, %v1959_v20  ;;  %2049 = vst.msk [vmem:[%s3354_s2 + $0x28] sm:$0xff] %vm1538_vm1, %v2960_v52  ;;  %v2962_v40 = vpop.eup %2961  ;;  %2973 = vpow2.f32 %v1821_v16 }
 0x2ea   : > { %v2964_v22 = vpop.eup %2963  ;;  %2047 = vst.msk [vmem:[%s3354_s2 + $0x18] sm:$0xff] %vm1538_vm1, %v2962_v40  ;;  %2975 = vpow2.f32 %v1825_v3 }
 0x2eb   : > { %v2042_v62 = vsel %vm2026_vm2, %v1975_v63, 0.0  ;;  %v2966_v9 = vpop.eup %2965  ;;  %2050 = vst.msk [vmem:[%s3354_s2 + $0x30] sm:$0xff] %vm1538_vm1, %v2964_v22  ;;  %2977 = vpow2.f32 %v1829_v27 }
 0x2ec   : > { %2052 = vst.msk [vmem:[%s3354_s2 + $0x40] sm:$0xff] %vm1538_vm1, %v2966_v9  ;;  %v2968_v44 = vpop.eup %2967  ;;  %2979 = vpow2.f32 %v1827_v55 }
 0x2ed   : > { %v2970_v51 = vpop.eup %2969  ;;  %2051 = vst.msk [vmem:[%s3354_s2 + $0x38] sm:$0xff] %vm1538_vm1, %v2968_v44  ;;  %2981 = vpow2.f32 %v1831_v53 }
 0x2ee   : > { %2053 = vst.msk [vmem:[%s3354_s2 + $0x48] sm:$0xff] %vm1538_vm1, %v2970_v51  ;;  %v2972_v43 = vpop.eup %2971 }
 0x2ef   : > { %v2974_v19 = vpop.eup %2973  ;;  %2055 = vst.msk [vmem:[%s3354_s2 + $0x58] sm:$0xff] %vm1538_vm1, %v2972_v43 }
 0x2f0   : > { %2104 = vrot.lane.b32.xlu2 %v2042_v62, %s3144_s30  ;;  %v2976_v12 = vpop.eup %2975  ;;  %2054 = vst.msk [vmem:[%s3354_s2 + $0x50] sm:$0xff] %vm1538_vm1, %v2974_v19 }
 0x2f1   : > { %2056 = vst.msk [vmem:[%s3354_s2 + $0x60] sm:$0xff] %vm1538_vm1, %v2976_v12  ;;  %v2978_v18 = vpop.eup %2977 }
 0x2f2   : > { %v2980_v58 = vpop.eup %2979  ;;  %2058 = vst.msk [vmem:[%s3354_s2 + $0x70] sm:$0xff] %vm1538_vm1, %v2978_v18 }
 0x2f3   : > { %v2982_v50 = vpop.eup %2981  ;;  %2057 = vst.msk [vmem:[%s3354_s2 + $0x68] sm:$0xff] %vm1538_vm1, %v2980_v58 }
 0x2f4   : > { %2059 = vst.msk [vmem:[%s3354_s2 + $0x78] sm:$0xff] %vm1538_vm1, %v2982_v50 }
 0x310   : > { %v2077_v36 = vpop.permute.xlu0 %2076 }
 0x311   : > { %2125 = vst.msk [vmem:[%s3354_s2] sm:$0xff] %vm2124_vm3, %v2077_v36  ;;  %v2081_v60 = vpop.permute.xlu1 %2080 }
 0x312   : > { %2127 = vst.msk [vmem:[%s3354_s2 + $0x10] sm:$0xff] %vm2124_vm3, %v2081_v60 }
 0x313   : > { %v2085_v30 = vpop.permute.xlu2 %2084 }
 0x314   : > { %2129 = vst.msk [vmem:[%s3354_s2 + $0x20] sm:$0xff] %vm2124_vm3, %v2085_v30 }
 0x318   : > { %v2079_v17 = vpop.permute.xlu0 %2078 }
 0x319   : > { %2126 = vst.msk [vmem:[%s3354_s2 + $0x8] sm:$0xff] %vm2124_vm3, %v2079_v17  ;;  %v2083_v32 = vpop.permute.xlu1 %2082 }
 0x31a   : > { %2128 = vst.msk [vmem:[%s3354_s2 + $0x18] sm:$0xff] %vm2124_vm3, %v2083_v32 }
 0x320   : > { %v2089_v25 = vpop.permute.xlu0 %2088 }
 0x321   : > { %2131 = vst.msk [vmem:[%s3354_s2 + $0x30] sm:$0xff] %vm2124_vm3, %v2089_v25  ;;  %v2091_v38 = vpop.permute.xlu1 %2090 }
 0x322   : > { %2132 = vst.msk [vmem:[%s3354_s2 + $0x38] sm:$0xff] %vm2124_vm3, %v2091_v38 }
 0x328   : > { %v2095_v7 = vpop.permute.xlu0 %2094 }
 0x329   : > { %2134 = vst.msk [vmem:[%s3354_s2 + $0x48] sm:$0xff] %vm2124_vm3, %v2095_v7  ;;  %v2087_v46 = vpop.permute.xlu2 %2086 }
 0x32a   : > { %2130 = vst.msk [vmem:[%s3354_s2 + $0x28] sm:$0xff] %vm2124_vm3, %v2087_v46 }
 0x337   : > { %v2097_v2 = vpop.permute.xlu1 %2096 }
 0x338   : > { %2135 = vst.msk [vmem:[%s3354_s2 + $0x50] sm:$0xff] %vm2124_vm3, %v2097_v2 }
 0x33a   : > { %v2093_v15 = vpop.permute.xlu2 %2092 }
 0x33b   : > { %2133 = vst.msk [vmem:[%s3354_s2 + $0x40] sm:$0xff] %vm2124_vm3, %v2093_v15 }
 0x33c   : > { %v2101_v54 = vpop.permute.xlu0 %2100 }
 0x33d   : > { %2137 = vst.msk [vmem:[%s3354_s2 + $0x60] sm:$0xff] %vm2124_vm3, %v2101_v54 }
 0x342   : > { %v2099_v45 = vpop.permute.xlu2 %2098 }
 0x343   : > { %2136 = vst.msk [vmem:[%s3354_s2 + $0x58] sm:$0xff] %vm2124_vm3, %v2099_v45 }
 0x347   : > { %v2103_v47 = vpop.permute.xlu1 %2102 }
 0x348   : > { %2138 = vst.msk [vmem:[%s3354_s2 + $0x68] sm:$0xff] %vm2124_vm3, %v2103_v47 }
 0x34a   : > { %v2105_v14 = vpop.permute.xlu2 %2104 }
 0x34b   : > { %2139 = vst.msk [vmem:[%s3354_s2 + $0x70] sm:$0xff] %vm2124_vm3, %v2105_v14 }
 0x34c   : > { %v2107_v21 = vpop.permute.xlu0 %2106 }
 0x34d   : > { %2140 = vst.msk [vmem:[%s3354_s2 + $0x78] sm:$0xff] %vm2124_vm3, %v2107_v21 }
 0x34e PF: > { %s23_s8 = sadd.s32 1, %s3137_s8   ;;  %s4347_s30 = sld [smem:[#allocation10_spill]] }
 0x34f   : > { %p20_p10 = scmp.ge.s32.totalorder %s23_s8, 6   ;;  %s4348_s20 = sld [smem:[#allocation11_spill]] }
 0x350   : > { %s4349_s7 = sld [smem:[#allocation12_spill]]  ;;  %s4350_s23 = smov %s3101_s24 }
 0x351   : > { %s4351_s24 = smov %s3105_s25  ;;  %s4352_s25 = smov %s3300_s21 }
 0x352   : > { %s4353_s26 = smov %s3113_s27  ;;  %s4354_s27 = smov %s3117_s28 }
 0x353   : > { %s4355_s28 = smov %s3308_s17  ;;  %s4356_s29 = smov %s3129_s5 }
 0x354   :  { %22 = sbr.rel (!%p20_p10) target bundleno = 15 (0xf), region = 114 }
 0x355   : > { %s4357_s5 = smov %s4348_s20 }
 0x359   :  { %2163 = vsyncpa [#allocation5], 1 }
 0x35a   :  { %2165 = vsyncpa [#allocation5 + $0x1], 1 }
 0x35b   :  { %2166 = vsyncpa [#allocation7], 1 }
 0x35c   :  { %2168 = vsyncpa [#allocation7 + $0x1], 1 }

</bundles_post_ra>
